<compile_context>
chip_gen: v6e
topology: v6e:2x2x1
jax: 0.10.0
libtpu: 0.0.40
codegen_flags: <defaults>
</compile_context>

<pallas_src>
import functools
import math

import jax
import jax.numpy as jnp
from jax import lax
from jax.experimental import pallas as pl
from jax.experimental.pallas import tpu as pltpu

LN_EPS = 1e-5  # torch.nn.LayerNorm default


def _layernorm(x, w, b):
    mu = jnp.mean(x, axis=-1, keepdims=True)
    var = jnp.mean(jnp.square(x - mu), axis=-1, keepdims=True)
    return (x - mu) * lax.rsqrt(var + LN_EPS) * w + b


def _erf(x):
    # Abramowitz & Stegun 7.1.26 (|err| < 1.5e-7): only exp / mul / add / where, all of
    # which lower cleanly on Mosaic.  Matches torch nn.GELU()'s exact-erf formulation.
    sign = jnp.where(x >= 0.0, 1.0, -1.0)
    a = jnp.abs(x)
    t = 1.0 / (1.0 + 0.3275911 * a)
    poly = t * (0.254829592 + t * (-0.284496736 + t * (1.421413741
               + t * (-1.453152027 + t * 1.061405429))))
    return sign * (1.0 - poly * jnp.exp(-a * a))


def _gelu_exact(x):
    return 0.5 * x * (1.0 + _erf(x * (1.0 / math.sqrt(2.0))))


# ----------------------------- fused kernel --------------------------------

def fused_vit_kernel(patches_ref, w_patch_ref, b_patch_ref, pos_ref,
                     vecs_ref, w_qkv_ref, w_o_ref, w1_ref, b1_ref, w2_ref,
                     h_lnw_ref, h_lnb_ref, w_head_ref, b_head_ref,
                     o_ref, acc_ref, attn_ref,
                     *, heads, dim_head, scale):
    layer = pl.program_id(1)
    n_layers = pl.num_programs(1)
    b_tile, n_tok, dim = acc_ref.shape
    inner = heads * dim_head
    rows = b_tile * n_tok

    # -------- layer 0: patch embedding + positional embedding (init resident accumulator)
    @pl.when(layer == 0)
    def _():
        p = patches_ref[...].reshape(rows, patches_ref.shape[-1])    # bf16 (host-cast)
        emb = jnp.dot(p, w_patch_ref[...],
                      preferred_element_type=jnp.float32)            # (rows, D) f32
        emb = emb + b_patch_ref[...]
        acc_ref[...] = emb.reshape(b_tile, n_tok, dim) + pos_ref[...]

    x = acc_ref[...]                                                 # (b_tile, N, D) f32, VMEM-resident
    x2 = x.reshape(rows, dim)

    # -------- per-layer small vectors: one packed DMA, sliced here
    vecs = vecs_ref[0]                                               # (6, D) f32
    a_lnw, a_lnb = vecs[0:1], vecs[1:2]
    b_o = vecs[2:3]
    f_lnw, f_lnb = vecs[3:4], vecs[4:5]
    b2 = vecs[5:6]

    # -------- attention: PreNorm -> qkv -> (q*scale).k^T -> ReLU -> softmax -> .V -> proj (+res)
    xn = _layernorm(x2, a_lnw, a_lnb)
    qkv = jnp.dot(xn.astype(jnp.bfloat16), w_qkv_ref[0],
                  preferred_element_type=jnp.float32)                # (rows, 3*inner) f32
    qkv = qkv.reshape(b_tile, n_tok, 3 * inner)

    # Group heads so stores into attn_ref are as wide / as aligned as possible (128-lane
    # groups at production dims; degrades gracefully at toy dims).
    hpg = min(heads, max(1, 128 // dim_head))
    while heads % hpg:
        hpg -= 1
    # NOTE: for large head counts (12-16) switch this static unroll to a lax.fori_loop over
    # head groups (unroll=True within a group) to bound vreg live ranges.
    group = []
    for h in range(heads):
        lo = h * dim_head
        q = (qkv[:, :, lo:lo + dim_head] * scale).astype(jnp.bfloat16)   # scale folded into q
        k = qkv[:, :, inner + lo:inner + lo + dim_head].astype(jnp.bfloat16)
        v = qkv[:, :, 2 * inner + lo:2 * inner + lo + dim_head].astype(jnp.bfloat16)
        # batched (over b_tile) q.k^T, no explicit transpose
        dots = lax.dot_general(q, k, (((2,), (2,)), ((0,), (0,))),
                               preferred_element_type=jnp.float32)       # (b_tile, N, N)
        dots = jnp.maximum(dots, 0.0)                                    # self.ReLU(dots)
        m = jnp.max(dots, axis=-1, keepdims=True)
        e = jnp.exp(dots - m)
        p_attn = e * pl.reciprocal(jnp.sum(e, axis=-1, keepdims=True), approx=True)
        out_h = lax.dot_general(p_attn.astype(jnp.bfloat16), v,
                                (((2,), (1,)), ((0,), (0,))),
                                preferred_element_type=jnp.float32)      # (b_tile, N, dh)
        group.append(out_h.astype(jnp.bfloat16))
        if len(group) == hpg or h == heads - 1:
            start = (h + 1 - len(group)) * dim_head
            blk = group[0] if len(group) == 1 else jnp.concatenate(group, axis=-1)
            attn_ref[:, :, start:start + len(group) * dim_head] = blk    # one wide bf16 store
            group = []

    proj = jnp.dot(attn_ref[...].reshape(rows, inner), w_o_ref[0],
                   preferred_element_type=jnp.float32) + b_o
    x2 = x2 + proj                                                   # residual

    # -------- feedforward: PreNorm -> Linear -> exact GELU -> Linear (+res)
    # NOTE: for ViT-L-class dims on v7x (64 MiB VMEM) split this along the hidden axis
    # (chunked w1/w2 accumulation) instead of shrinking token/D tiles.
    xn = _layernorm(x2, f_lnw, f_lnb)
    h1 = jnp.dot(xn.astype(jnp.bfloat16), w1_ref[0],
                 preferred_element_type=jnp.float32) + b1_ref[0]
    h1 = _gelu_exact(h1)
    y = jnp.dot(h1.astype(jnp.bfloat16), w2_ref[0],
                preferred_element_type=jnp.float32) + b2
    x2 = x2 + y                                                      # residual
    acc_ref[...] = x2.reshape(b_tile, n_tok, dim)

    # -------- last layer: mean over tokens -> LayerNorm -> classifier (lane-padded store)
    @pl.when(layer == n_layers - 1)
    def _():
        pooled = jnp.mean(x2.reshape(b_tile, n_tok, dim), axis=1)    # (b_tile, D)
        pooled = _layernorm(pooled, h_lnw_ref[...], h_lnb_ref[...])
        logits = jnp.dot(pooled.astype(jnp.bfloat16), w_head_ref[...],
                         preferred_element_type=jnp.float32) + b_head_ref[...]
        o_ref[:, 0, :] = logits


# ----------------------------- wrapper --------------------------------------

def vit_forward(img, params, *, patch_size, heads, dim_head, b_tile=None):
    patches = to_patches(img, patch_size).astype(jnp.bfloat16)      # host-side bf16 cast
    B, N, P = patches.shape
    D = params["patch_w"].shape[1]
    depth = params["w_qkv"].shape[0]
    inner = heads * dim_head
    hidden = params["w1"].shape[2]
    c_pad = params["head_w"].shape[1]

    if b_tile is None:
        b_tile = B if B <= 8 else 8
    assert B % b_tile == 0, "batch must be divisible by the batch tile"
    n_bsteps = B // b_tile     # keep even on v7x so both TensorCores get equal work

    # Explicit VMEM budget: double-buffered per-layer weight streams + resident scratch
    # + once-fetched constants (bytes).
    per_layer = 2 * (D * 3 * inner + inner * D + D * hidden + hidden * D) \
                + 4 * (6 * D + hidden)
    resident = 4 * (b_tile * N * D) + 2 * (b_tile * N * inner) \
               + 2 * (P * D + D * c_pad) + 4 * (N * D + 3 * D + c_pad)
    streams = 2 * per_layer + 2 * 2 * (b_tile * N * P) + 2 * 4 * (b_tile * c_pad)
    vmem_limit = min(128 * 1024 * 1024,
                     max(32 * 1024 * 1024, int(1.5 * (resident + streams))))

    kern = functools.partial(fused_vit_kernel, heads=heads, dim_head=dim_head,
                             scale=dim_head ** -0.5)
    rep2 = lambda b, l: (0, 0)
    rep3 = lambda b, l: (0, 0, 0)
    perl = lambda b, l: (l, 0, 0)

    # Correctness note: the resident-accumulator pattern requires depth to stay the
    # innermost grid axis and be marked "arbitrary".
    out = pl.pallas_call(
        kern,
        out_shape=jax.ShapeDtypeStruct((B, 1, c_pad), jnp.float32),
        grid=(n_bsteps, depth),
        in_specs=[
            pl.BlockSpec((b_tile, N, P), lambda b, l: (b, 0, 0)),   # patches (bf16)
            pl.BlockSpec((P, D), rep2),                             # patch_w (bf16)
            pl.BlockSpec((1, D), rep2),                             # patch_b
            pl.BlockSpec((1, N, D), rep3),                          # pos
            pl.BlockSpec((1, 6, D), perl),                          # packed LN/bias vectors
            pl.BlockSpec((1, D, 3 * inner), perl),                  # w_qkv (bf16)
            pl.BlockSpec((1, inner, D), perl),                      # w_o (bf16)
            pl.BlockSpec((1, D, hidden), perl),                     # w1 (bf16)
            pl.BlockSpec((1, 1, hidden), perl),                     # b1
            pl.BlockSpec((1, hidden, D), perl),                     # w2 (bf16)
            pl.BlockSpec((1, D), rep2),                             # head ln_w
            pl.BlockSpec((1, D), rep2),                             # head ln_b
            pl.BlockSpec((D, c_pad), rep2),                         # head_w (bf16, lane-padded)
            pl.BlockSpec((1, c_pad), rep2),                         # head_b
        ],
        out_specs=pl.BlockSpec((b_tile, 1, c_pad), lambda b, l: (b, 0, 0)),
        scratch_shapes=[pltpu.VMEM((b_tile, N, D), jnp.float32),        # resident activation
                        pltpu.VMEM((b_tile, N, inner), jnp.bfloat16)],  # attention output (bf16)
        compiler_params=pltpu.CompilerParams(
            dimension_semantics=("parallel", "arbitrary"),
            vmem_limit_bytes=vmem_limit),
    )(patches, params["patch_w"], params["patch_b"], params["pos"],
      params["layer_vecs"], params["w_qkv"], params["w_o"],
      params["w1"], params["b1"], params["w2"],
      params["head_lnw"], params["head_lnb"], params["head_w"], params["head_b"])
    return out[:, 0, :]                                             # (B, c_pad)


# ----------------------------- glue / params -------------------------------

def to_patches(img, patch_size):
    # einops: 'b c (h p1) (w p2) -> b (h w) (p1 p2 c)'
    b, c, H, W = img.shape
    p = patch_size
    h, w = H // p, W // p
    x = img.reshape(b, c, h, p, w, p)
    x = x.transpose(0, 2, 4, 3, 5, 1)                               # (b, h, w, p1, p2, c)
    return x.reshape(b, h * w, p * p * c)


def xavier_normal(key, fan_in, fan_out):
    std = math.sqrt(2.0 / (fan_in + fan_out))
    return std * jax.random.normal(key, (fan_in, fan_out), dtype=jnp.float32)


def init_vit_params(key, *, patch_dim, dim, depth, heads, dim_head, mlp_dim_ratio,
                    num_classes, num_patches, lane_pad=128):
    inner = heads * dim_head
    hidden = dim * mlp_dim_ratio
    c_pad = max(lane_pad, num_classes)
    keys = iter(jax.random.split(key, 3 + 4 * depth))

    head_w = jnp.zeros((dim, c_pad), jnp.float32)
    head_w = head_w.at[:, :num_classes].set(xavier_normal(next(keys), dim, num_classes))

    patch_w = xavier_normal(next(keys), patch_dim, dim)
    pos = jax.random.normal(next(keys), (1, num_patches, dim), dtype=jnp.float32)

    w_qkv = jnp.stack([xavier_normal(next(keys), dim, 3 * inner) for _ in range(depth)])
    w_o = jnp.stack([xavier_normal(next(keys), inner, dim) for _ in range(depth)])
    w1 = jnp.stack([xavier_normal(next(keys), dim, hidden) for _ in range(depth)])
    w2 = jnp.stack([xavier_normal(next(keys), hidden, dim) for _ in range(depth)])

    # Packed per-layer vectors [a_lnw, a_lnb, b_o, f_lnw, f_lnb, b2] -> (depth, 6, dim):
    # one DMA descriptor per layer instead of six.
    ones_d = jnp.ones((depth, dim), jnp.float32)
    zeros_d = jnp.zeros((depth, dim), jnp.float32)
    layer_vecs = jnp.stack([ones_d, zeros_d, zeros_d, ones_d, zeros_d, zeros_d], axis=1)

    return {
        # Matmul weights stored in bf16 (halves weight DMA, MXU-native); f32 accumulation
        # in-kernel.  (On v7x, fp8 weight quant would halve DMA again — accuracy trade-off,
        # not done here.)
        "patch_w": patch_w.astype(jnp.bfloat16),
        "patch_b": jnp.zeros((1, dim), jnp.float32),
        "pos": pos,
        "layer_vecs": layer_vecs,
        "w_qkv": w_qkv.astype(jnp.bfloat16),                        # to_qkv has bias=False
        "w_o": w_o.astype(jnp.bfloat16),
        "w1": w1.astype(jnp.bfloat16),
        "b1": jnp.zeros((depth, 1, hidden), jnp.float32),
        "w2": w2.astype(jnp.bfloat16),
        "head_lnw": jnp.ones((1, dim), jnp.float32),
        "head_lnb": jnp.zeros((1, dim), jnp.float32),
        "head_w": head_w.astype(jnp.bfloat16),
        "head_b": jnp.zeros((1, c_pad), jnp.float32),
    }


# ----------------------------- main -----------------------------------------

if __name__ == "__main__":
    batch = 2
    channels = 4
    img_size = 16
    patch_size = 4
    dim = 32            # production: keep dim / hidden multiples of 256 for v6e/v7x MXU shapes
    depth = 2
    heads = 2
    dim_head = 16
    mlp_dim_ratio = 2
    num_classes = 8

    num_patches = (img_size // patch_size) ** 2                     # 16
    patch_dim = channels * patch_size * patch_size                  # 64

    key = jax.random.PRNGKey(0)
    k_img, k_params = jax.random.split(key)

    img = jax.random.normal(k_img, (batch, channels, img_size, img_size),
                            dtype=jnp.float32)                      # NCHW, like PyTorch
    params = init_vit_params(
        k_params, patch_dim=patch_dim, dim=dim, depth=depth, heads=heads,
        dim_head=dim_head, mlp_dim_ratio=mlp_dim_ratio,
        num_classes=num_classes, num_patches=num_patches)

    logits_padded = vit_forward(img, params, patch_size=patch_size, heads=heads,
                                dim_head=dim_head, b_tile=2)
    out = logits_padded[:, :num_classes]                            # drop lane padding
    out = jax.block_until_ready(out)
    assert out.shape == (batch, num_classes) and out.dtype == jnp.float32
    print("KERNEL_OK")
</pallas_src>

<mosaic_0001>
module attributes {stable_mosaic.version = 11 : i64} {
  func.func @fused_vit_kernel(%arg0: i32, %arg1: i32, %arg2: memref<2x16x64xbf16, #tpu.memory_space<vmem>>, %arg3: memref<64x32xbf16, #tpu.memory_space<vmem>>, %arg4: memref<1x32xf32, #tpu.memory_space<vmem>>, %arg5: memref<1x16x32xf32, #tpu.memory_space<vmem>>, %arg6: memref<1x6x32xf32, #tpu.memory_space<vmem>>, %arg7: memref<1x32x96xbf16, #tpu.memory_space<vmem>>, %arg8: memref<1x32x32xbf16, #tpu.memory_space<vmem>>, %arg9: memref<1x32x64xbf16, #tpu.memory_space<vmem>>, %arg10: memref<1x1x64xf32, #tpu.memory_space<vmem>>, %arg11: memref<1x64x32xbf16, #tpu.memory_space<vmem>>, %arg12: memref<1x32xf32, #tpu.memory_space<vmem>>, %arg13: memref<1x32xf32, #tpu.memory_space<vmem>>, %arg14: memref<32x128xbf16, #tpu.memory_space<vmem>>, %arg15: memref<1x128xf32, #tpu.memory_space<vmem>>, %arg16: memref<2x1x128xf32, #tpu.memory_space<vmem>>, %arg17: memref<2x16x32xf32, #tpu.memory_space<vmem>>, %arg18: memref<2x16x32xbf16, #tpu.memory_space<vmem>>) attributes {dimension_semantics = [#tpu.dimension_semantics<parallel>, #tpu.dimension_semantics<arbitrary>], iteration_bounds = array<i64: 1, 2>, scalar_prefetch = 0 : i64, scratch_operands = 2 : i64, tpu.core_type = #tpu.core_type<tc>, window_params = [{transform_indices = @transform_0, window_bounds = array<i64: 2, 16, 64>}, {pipeline_mode = #tpu.pipeline_mode<synchronous>, transform_indices = @transform_1, window_bounds = array<i64: 64, 32>}, {pipeline_mode = #tpu.pipeline_mode<synchronous>, transform_indices = @transform_2, window_bounds = array<i64: 1, 32>}, {pipeline_mode = #tpu.pipeline_mode<synchronous>, transform_indices = @transform_3, window_bounds = array<i64: 1, 16, 32>}, {transform_indices = @transform_4, window_bounds = array<i64: 1, 6, 32>}, {transform_indices = @transform_5, window_bounds = array<i64: 1, 32, 96>}, {transform_indices = @transform_6, window_bounds = array<i64: 1, 32, 32>}, {transform_indices = @transform_7, window_bounds = array<i64: 1, 32, 64>}, {transform_indices = @transform_8, window_bounds = array<i64: 1, 1, 64>}, {transform_indices = @transform_9, window_bounds = array<i64: 1, 64, 32>}, {pipeline_mode = #tpu.pipeline_mode<synchronous>, transform_indices = @transform_10, window_bounds = array<i64: 1, 32>}, {pipeline_mode = #tpu.pipeline_mode<synchronous>, transform_indices = @transform_11, window_bounds = array<i64: 1, 32>}, {pipeline_mode = #tpu.pipeline_mode<synchronous>, transform_indices = @transform_12, window_bounds = array<i64: 32, 128>}, {pipeline_mode = #tpu.pipeline_mode<synchronous>, transform_indices = @transform_13, window_bounds = array<i64: 1, 128>}, {transform_indices = @transform_14, window_bounds = array<i64: 2, 1, 128>}]} {
    %c0_i32 = arith.constant 0 : i32
    %0 = arith.cmpi eq, %arg1, %c0_i32 : i32
    %1 = arith.extui %0 : i1 to i32
    %c0_i32_0 = arith.constant 0 : i32
    %2 = arith.cmpi ne, %1, %c0_i32_0 : i32
    scf.if %2 {
      %c0_72 = arith.constant 0 : index
      %c0_73 = arith.constant 0 : index
      %c0_74 = arith.constant 0 : index
      %181 = vector.load %arg2[%c0_72, %c0_73, %c0_74] : memref<2x16x64xbf16, #tpu.memory_space<vmem>>, vector<2x16x64xbf16>
      %182 = vector.shape_cast %181 : vector<2x16x64xbf16> to vector<32x64xbf16>
      %c0_75 = arith.constant 0 : index
      %c0_76 = arith.constant 0 : index
      %183 = vector.load %arg3[%c0_75, %c0_76] : memref<64x32xbf16, #tpu.memory_space<vmem>>, vector<64x32xbf16>
      %cst_77 = arith.constant dense<0.000000e+00> : vector<32x32xf32>
      %184 = tpu.matmul %182, %183, %cst_77 {dimension_numbers = #tpu.dot_dimension_numbers<[1], [0], [0], [1], [0, 0, 1, 1], [], []>} : vector<32x64xbf16>, vector<64x32xbf16>, vector<32x32xf32> -> vector<32x32xf32>
      %c0_78 = arith.constant 0 : index
      %c0_79 = arith.constant 0 : index
      %185 = vector.load %arg4[%c0_78, %c0_79] : memref<1x32xf32, #tpu.memory_space<vmem>>, vector<1x32xf32>
      %186 = vector.broadcast %185 : vector<1x32xf32> to vector<32x32xf32>
      %187 = arith.addf %184, %186 : vector<32x32xf32>
      %188 = vector.shape_cast %187 : vector<32x32xf32> to vector<2x16x32xf32>
      %c0_80 = arith.constant 0 : index
      %c0_81 = arith.constant 0 : index
      %c0_82 = arith.constant 0 : index
      %189 = vector.load %arg5[%c0_80, %c0_81, %c0_82] : memref<1x16x32xf32, #tpu.memory_space<vmem>>, vector<1x16x32xf32>
      %190 = vector.broadcast %189 : vector<1x16x32xf32> to vector<2x16x32xf32>
      %191 = arith.addf %188, %190 : vector<2x16x32xf32>
      %c0_83 = arith.constant 0 : index
      %c0_84 = arith.constant 0 : index
      %c0_85 = arith.constant 0 : index
      %192 = vector.load %arg17[%c0_83, %c0_84, %c0_85] : memref<2x16x32xf32, #tpu.memory_space<vmem>>, vector<2x16x32xf32>
      tpu.vector_store %arg17[%c0_83, %c0_84, %c0_85], %191 {strides = array<i32>} : memref<2x16x32xf32, #tpu.memory_space<vmem>>, vector<2x16x32xf32>,
    } else {
    }
    %c0 = arith.constant 0 : index
    %c0_1 = arith.constant 0 : index
    %c0_2 = arith.constant 0 : index
    %3 = vector.load %arg17[%c0, %c0_1, %c0_2] : memref<2x16x32xf32, #tpu.memory_space<vmem>>, vector<2x16x32xf32>
    %4 = vector.shape_cast %3 : vector<2x16x32xf32> to vector<32x32xf32>
    %c0_3 = arith.constant 0 : index
    %c0_4 = arith.constant 0 : index
    %c0_5 = arith.constant 0 : index
    %5 = vector.load %arg6[%c0_3, %c0_4, %c0_5] : memref<1x6x32xf32, #tpu.memory_space<vmem>>, vector<1x6x32xf32>
    %6 = vector.shape_cast %5 : vector<1x6x32xf32> to vector<6x32xf32>
    %7 = vector.extract_strided_slice %6 {offsets = [0, 0], sizes = [1, 32], strides = [1, 1]} : vector<6x32xf32> to vector<1x32xf32>
    %8 = vector.extract_strided_slice %6 {offsets = [1, 0], sizes = [1, 32], strides = [1, 1]} : vector<6x32xf32> to vector<1x32xf32>
    %9 = vector.extract_strided_slice %6 {offsets = [2, 0], sizes = [1, 32], strides = [1, 1]} : vector<6x32xf32> to vector<1x32xf32>
    %10 = vector.extract_strided_slice %6 {offsets = [3, 0], sizes = [1, 32], strides = [1, 1]} : vector<6x32xf32> to vector<1x32xf32>
    %11 = vector.extract_strided_slice %6 {offsets = [4, 0], sizes = [1, 32], strides = [1, 1]} : vector<6x32xf32> to vector<1x32xf32>
    %12 = vector.extract_strided_slice %6 {offsets = [5, 0], sizes = [1, 32], strides = [1, 1]} : vector<6x32xf32> to vector<1x32xf32>
    %cst = arith.constant dense<0.000000e+00> : vector<32xf32>
    %13 = vector.multi_reduction <add>, %4, %cst [1] : vector<32x32xf32> to vector<32xf32>
    %14 = vector.shape_cast %13 : vector<32xf32> to vector<32x1xf32>
    %cst_6 = arith.constant 3.200000e+01 : f32
    %15 = vector.broadcast %cst_6 : f32 to vector<32x1xf32>
    %16 = arith.divf %14, %15 : vector<32x1xf32>
    %17 = vector.broadcast %16 : vector<32x1xf32> to vector<32x32xf32>
    %18 = arith.subf %4, %17 : vector<32x32xf32>
    %19 = arith.mulf %18, %18 : vector<32x32xf32>
    %cst_7 = arith.constant dense<0.000000e+00> : vector<32xf32>
    %20 = vector.multi_reduction <add>, %19, %cst_7 [1] : vector<32x32xf32> to vector<32xf32>
    %21 = vector.shape_cast %20 : vector<32xf32> to vector<32x1xf32>
    %cst_8 = arith.constant 3.200000e+01 : f32
    %22 = vector.broadcast %cst_8 : f32 to vector<32x1xf32>
    %23 = arith.divf %21, %22 : vector<32x1xf32>
    %24 = vector.broadcast %16 : vector<32x1xf32> to vector<32x32xf32>
    %25 = arith.subf %4, %24 : vector<32x32xf32>
    %cst_9 = arith.constant 9.99999974E-6 : f32
    %26 = vector.broadcast %cst_9 : f32 to vector<32x1xf32>
    %27 = arith.addf %23, %26 : vector<32x1xf32>
    %28 = math.rsqrt %27 : vector<32x1xf32>
    %29 = vector.broadcast %28 : vector<32x1xf32> to vector<32x32xf32>
    %30 = arith.mulf %25, %29 : vector<32x32xf32>
    %31 = vector.broadcast %7 : vector<1x32xf32> to vector<32x32xf32>
    %32 = arith.mulf %30, %31 : vector<32x32xf32>
    %33 = vector.broadcast %8 : vector<1x32xf32> to vector<32x32xf32>
    %34 = arith.addf %32, %33 : vector<32x32xf32>
    %35 = arith.truncf %34 : vector<32x32xf32> to vector<32x32xbf16>
    %c0_10 = arith.constant 0 : index
    %c0_11 = arith.constant 0 : index
    %c0_12 = arith.constant 0 : index
    %36 = vector.load %arg7[%c0_10, %c0_11, %c0_12] : memref<1x32x96xbf16, #tpu.memory_space<vmem>>, vector<1x32x96xbf16>
    %37 = vector.shape_cast %36 : vector<1x32x96xbf16> to vector<32x96xbf16>
    %cst_13 = arith.constant dense<0.000000e+00> : vector<32x96xf32>
    %38 = tpu.matmul %35, %37, %cst_13 {dimension_numbers = #tpu.dot_dimension_numbers<[1], [0], [0], [1], [0, 0, 1, 1], [], []>} : vector<32x32xbf16>, vector<32x96xbf16>, vector<32x96xf32> -> vector<32x96xf32>
    %39 = vector.shape_cast %38 : vector<32x96xf32> to vector<2x16x96xf32>
    %40 = vector.extract_strided_slice %39 {offsets = [0, 0, 0], sizes = [2, 16, 16], strides = [1, 1, 1]} : vector<2x16x96xf32> to vector<2x16x16xf32>
    %cst_14 = arith.constant 2.500000e-01 : f32
    %41 = vector.broadcast %cst_14 : f32 to vector<2x16x16xf32>
    %42 = arith.mulf %40, %41 : vector<2x16x16xf32>
    %43 = arith.truncf %42 : vector<2x16x16xf32> to vector<2x16x16xbf16>
    %44 = vector.extract_strided_slice %39 {offsets = [0, 0, 32], sizes = [2, 16, 16], strides = [1, 1, 1]} : vector<2x16x96xf32> to vector<2x16x16xf32>
    %45 = arith.truncf %44 : vector<2x16x16xf32> to vector<2x16x16xbf16>
    %46 = vector.extract_strided_slice %39 {offsets = [0, 0, 64], sizes = [2, 16, 16], strides = [1, 1, 1]} : vector<2x16x96xf32> to vector<2x16x16xf32>
    %47 = arith.truncf %46 : vector<2x16x16xf32> to vector<2x16x16xbf16>
    %cst_15 = arith.constant dense<0.000000e+00> : vector<2x16x16xf32>
    %48 = tpu.matmul %43, %45, %cst_15 {dimension_numbers = #tpu.dot_dimension_numbers<[2], [2], [1], [1], [0, 0, 0, 1, 1, 1], [0], [0]>} : vector<2x16x16xbf16>, vector<2x16x16xbf16>, vector<2x16x16xf32> -> vector<2x16x16xf32>
    %cst_16 = arith.constant 0.000000e+00 : f32
    %49 = vector.broadcast %cst_16 : f32 to vector<2x16x16xf32>
    %50 = arith.maximumf %48, %49 : vector<2x16x16xf32>
    %cst_17 = arith.constant dense<0xFF800000> : vector<2x16xf32>
    %51 = vector.multi_reduction <maximumf>, %50, %cst_17 [2] : vector<2x16x16xf32> to vector<2x16xf32>
    %52 = vector.shape_cast %51 : vector<2x16xf32> to vector<2x16x1xf32>
    %53 = vector.broadcast %52 : vector<2x16x1xf32> to vector<2x16x16xf32>
    %54 = arith.subf %50, %53 : vector<2x16x16xf32>
    %55 = math.exp %54 : vector<2x16x16xf32>
    %cst_18 = arith.constant dense<0.000000e+00> : vector<2x16xf32>
    %56 = vector.multi_reduction <add>, %55, %cst_18 [2] : vector<2x16x16xf32> to vector<2x16xf32>
    %57 = vector.shape_cast %56 : vector<2x16xf32> to vector<2x16x1xf32>
    %58 = tpu.reciprocal %57 {approx = true} : vector<2x16x1xf32> -> vector<2x16x1xf32>
    %59 = vector.broadcast %58 : vector<2x16x1xf32> to vector<2x16x16xf32>
    %60 = arith.mulf %55, %59 : vector<2x16x16xf32>
    %61 = arith.truncf %60 : vector<2x16x16xf32> to vector<2x16x16xbf16>
    %cst_19 = arith.constant dense<0.000000e+00> : vector<2x16x16xf32>
    %62 = tpu.matmul %61, %47, %cst_19 {dimension_numbers = #tpu.dot_dimension_numbers<[2], [1], [1], [2], [0, 0, 0, 1, 1, 2], [0], [0]>} : vector<2x16x16xbf16>, vector<2x16x16xbf16>, vector<2x16x16xf32> -> vector<2x16x16xf32>
    %63 = arith.truncf %62 : vector<2x16x16xf32> to vector<2x16x16xbf16>
    %64 = vector.extract_strided_slice %39 {offsets = [0, 0, 16], sizes = [2, 16, 16], strides = [1, 1, 1]} : vector<2x16x96xf32> to vector<2x16x16xf32>
    %cst_20 = arith.constant 2.500000e-01 : f32
    %65 = vector.broadcast %cst_20 : f32 to vector<2x16x16xf32>
    %66 = arith.mulf %64, %65 : vector<2x16x16xf32>
    %67 = arith.truncf %66 : vector<2x16x16xf32> to vector<2x16x16xbf16>
    %68 = vector.extract_strided_slice %39 {offsets = [0, 0, 48], sizes = [2, 16, 16], strides = [1, 1, 1]} : vector<2x16x96xf32> to vector<2x16x16xf32>
    %69 = arith.truncf %68 : vector<2x16x16xf32> to vector<2x16x16xbf16>
    %70 = vector.extract_strided_slice %39 {offsets = [0, 0, 80], sizes = [2, 16, 16], strides = [1, 1, 1]} : vector<2x16x96xf32> to vector<2x16x16xf32>
    %71 = arith.truncf %70 : vector<2x16x16xf32> to vector<2x16x16xbf16>
    %cst_21 = arith.constant dense<0.000000e+00> : vector<2x16x16xf32>
    %72 = tpu.matmul %67, %69, %cst_21 {dimension_numbers = #tpu.dot_dimension_numbers<[2], [2], [1], [1], [0, 0, 0, 1, 1, 1], [0], [0]>} : vector<2x16x16xbf16>, vector<2x16x16xbf16>, vector<2x16x16xf32> -> vector<2x16x16xf32>
    %cst_22 = arith.constant 0.000000e+00 : f32
    %73 = vector.broadcast %cst_22 : f32 to vector<2x16x16xf32>
    %74 = arith.maximumf %72, %73 : vector<2x16x16xf32>
    %cst_23 = arith.constant dense<0xFF800000> : vector<2x16xf32>
    %75 = vector.multi_reduction <maximumf>, %74, %cst_23 [2] : vector<2x16x16xf32> to vector<2x16xf32>
    %76 = vector.shape_cast %75 : vector<2x16xf32> to vector<2x16x1xf32>
    %77 = vector.broadcast %76 : vector<2x16x1xf32> to vector<2x16x16xf32>
    %78 = arith.subf %74, %77 : vector<2x16x16xf32>
    %79 = math.exp %78 : vector<2x16x16xf32>
    %cst_24 = arith.constant dense<0.000000e+00> : vector<2x16xf32>
    %80 = vector.multi_reduction <add>, %79, %cst_24 [2] : vector<2x16x16xf32> to vector<2x16xf32>
    %81 = vector.shape_cast %80 : vector<2x16xf32> to vector<2x16x1xf32>
    %82 = tpu.reciprocal %81 {approx = true} : vector<2x16x1xf32> -> vector<2x16x1xf32>
    %83 = vector.broadcast %82 : vector<2x16x1xf32> to vector<2x16x16xf32>
    %84 = arith.mulf %79, %83 : vector<2x16x16xf32>
    %85 = arith.truncf %84 : vector<2x16x16xf32> to vector<2x16x16xbf16>
    %cst_25 = arith.constant dense<0.000000e+00> : vector<2x16x16xf32>
    %86 = tpu.matmul %85, %71, %cst_25 {dimension_numbers = #tpu.dot_dimension_numbers<[2], [1], [1], [2], [0, 0, 0, 1, 1, 2], [0], [0]>} : vector<2x16x16xbf16>, vector<2x16x16xbf16>, vector<2x16x16xf32> -> vector<2x16x16xf32>
    %87 = arith.truncf %86 : vector<2x16x16xf32> to vector<2x16x16xbf16>
    %88 = tpu.concatenate %63, %87 in 2 : vector<2x16x16xbf16>, vector<2x16x16xbf16> -> vector<2x16x32xbf16>
    %c0_26 = arith.constant 0 : index
    %c0_27 = arith.constant 0 : index
    %c0_28 = arith.constant 0 : index
    %89 = vector.load %arg18[%c0_26, %c0_27, %c0_28] : memref<2x16x32xbf16, #tpu.memory_space<vmem>>, vector<2x16x32xbf16>
    tpu.vector_store %arg18[%c0_26, %c0_27, %c0_28], %88 {strides = array<i32>} : memref<2x16x32xbf16, #tpu.memory_space<vmem>>, vector<2x16x32xbf16>,
    %c0_29 = arith.constant 0 : index
    %c0_30 = arith.constant 0 : index
    %c0_31 = arith.constant 0 : index
    %90 = vector.load %arg18[%c0_29, %c0_30, %c0_31] : memref<2x16x32xbf16, #tpu.memory_space<vmem>>, vector<2x16x32xbf16>
    %91 = vector.shape_cast %90 : vector<2x16x32xbf16> to vector<32x32xbf16>
    %c0_32 = arith.constant 0 : index
    %c0_33 = arith.constant 0 : index
    %c0_34 = arith.constant 0 : index
    %92 = vector.load %arg8[%c0_32, %c0_33, %c0_34] : memref<1x32x32xbf16, #tpu.memory_space<vmem>>, vector<1x32x32xbf16>
    %93 = vector.shape_cast %92 : vector<1x32x32xbf16> to vector<32x32xbf16>
    %cst_35 = arith.constant dense<0.000000e+00> : vector<32x32xf32>
    %94 = tpu.matmul %91, %93, %cst_35 {dimension_numbers = #tpu.dot_dimension_numbers<[1], [0], [0], [1], [0, 0, 1, 1], [], []>} : vector<32x32xbf16>, vector<32x32xbf16>, vector<32x32xf32> -> vector<32x32xf32>
    %95 = vector.broadcast %9 : vector<1x32xf32> to vector<32x32xf32>
    %96 = arith.addf %94, %95 : vector<32x32xf32>
    %97 = arith.addf %4, %96 : vector<32x32xf32>
    %cst_36 = arith.constant dense<0.000000e+00> : vector<32xf32>
    %98 = vector.multi_reduction <add>, %97, %cst_36 [1] : vector<32x32xf32> to vector<32xf32>
    %99 = vector.shape_cast %98 : vector<32xf32> to vector<32x1xf32>
    %cst_37 = arith.constant 3.200000e+01 : f32
    %100 = vector.broadcast %cst_37 : f32 to vector<32x1xf32>
    %101 = arith.divf %99, %100 : vector<32x1xf32>
    %102 = vector.broadcast %101 : vector<32x1xf32> to vector<32x32xf32>
    %103 = arith.subf %97, %102 : vector<32x32xf32>
    %104 = arith.mulf %103, %103 : vector<32x32xf32>
    %cst_38 = arith.constant dense<0.000000e+00> : vector<32xf32>
    %105 = vector.multi_reduction <add>, %104, %cst_38 [1] : vector<32x32xf32> to vector<32xf32>
    %106 = vector.shape_cast %105 : vector<32xf32> to vector<32x1xf32>
    %cst_39 = arith.constant 3.200000e+01 : f32
    %107 = vector.broadcast %cst_39 : f32 to vector<32x1xf32>
    %108 = arith.divf %106, %107 : vector<32x1xf32>
    %109 = vector.broadcast %101 : vector<32x1xf32> to vector<32x32xf32>
    %110 = arith.subf %97, %109 : vector<32x32xf32>
    %cst_40 = arith.constant 9.99999974E-6 : f32
    %111 = vector.broadcast %cst_40 : f32 to vector<32x1xf32>
    %112 = arith.addf %108, %111 : vector<32x1xf32>
    %113 = math.rsqrt %112 : vector<32x1xf32>
    %114 = vector.broadcast %113 : vector<32x1xf32> to vector<32x32xf32>
    %115 = arith.mulf %110, %114 : vector<32x32xf32>
    %116 = vector.broadcast %10 : vector<1x32xf32> to vector<32x32xf32>
    %117 = arith.mulf %115, %116 : vector<32x32xf32>
    %118 = vector.broadcast %11 : vector<1x32xf32> to vector<32x32xf32>
    %119 = arith.addf %117, %118 : vector<32x32xf32>
    %120 = arith.truncf %119 : vector<32x32xf32> to vector<32x32xbf16>
    %c0_41 = arith.constant 0 : index
    %c0_42 = arith.constant 0 : index
    %c0_43 = arith.constant 0 : index
    %121 = vector.load %arg9[%c0_41, %c0_42, %c0_43] : memref<1x32x64xbf16, #tpu.memory_space<vmem>>, vector<1x32x64xbf16>
    %122 = vector.shape_cast %121 : vector<1x32x64xbf16> to vector<32x64xbf16>
    %cst_44 = arith.constant dense<0.000000e+00> : vector<32x64xf32>
    %123 = tpu.matmul %120, %122, %cst_44 {dimension_numbers = #tpu.dot_dimension_numbers<[1], [0], [0], [1], [0, 0, 1, 1], [], []>} : vector<32x32xbf16>, vector<32x64xbf16>, vector<32x64xf32> -> vector<32x64xf32>
    %c0_45 = arith.constant 0 : index
    %c0_46 = arith.constant 0 : index
    %c0_47 = arith.constant 0 : index
    %124 = vector.load %arg10[%c0_45, %c0_46, %c0_47] : memref<1x1x64xf32, #tpu.memory_space<vmem>>, vector<1x1x64xf32>
    %125 = vector.shape_cast %124 : vector<1x1x64xf32> to vector<1x64xf32>
    %126 = vector.broadcast %125 : vector<1x64xf32> to vector<32x64xf32>
    %127 = arith.addf %123, %126 : vector<32x64xf32>
    %cst_48 = arith.constant 5.000000e-01 : f32
    %128 = vector.broadcast %cst_48 : f32 to vector<32x64xf32>
    %129 = arith.mulf %128, %127 : vector<32x64xf32>
    %cst_49 = arith.constant 0.707106769 : f32
    %130 = vector.broadcast %cst_49 : f32 to vector<32x64xf32>
    %131 = arith.mulf %127, %130 : vector<32x64xf32>
    %cst_50 = arith.constant 0.000000e+00 : f32
    %132 = vector.broadcast %cst_50 : f32 to vector<32x64xf32>
    %133 = arith.cmpf oge, %131, %132 : vector<32x64xf32>
    %cst_51 = arith.constant 1.000000e+00 : f32
    %cst_52 = arith.constant -1.000000e+00 : f32
    %134 = vector.broadcast %cst_51 : f32 to vector<32x64xf32>
    %135 = vector.broadcast %cst_52 : f32 to vector<32x64xf32>
    %136 = arith.select %133, %134, %135 : vector<32x64xi1>, vector<32x64xf32>
    %137 = math.absf %131 : vector<32x64xf32>
    %cst_53 = arith.constant 0.327591091 : f32
    %138 = vector.broadcast %cst_53 : f32 to vector<32x64xf32>
    %139 = arith.mulf %138, %137 : vector<32x64xf32>
    %cst_54 = arith.constant 1.000000e+00 : f32
    %140 = vector.broadcast %cst_54 : f32 to vector<32x64xf32>
    %141 = arith.addf %140, %139 : vector<32x64xf32>
    %cst_55 = arith.constant 1.000000e+00 : f32
    %142 = vector.broadcast %cst_55 : f32 to vector<32x64xf32>
    %143 = arith.divf %142, %141 : vector<32x64xf32>
    %cst_56 = arith.constant 1.06140542 : f32
    %144 = vector.broadcast %cst_56 : f32 to vector<32x64xf32>
    %145 = arith.mulf %143, %144 : vector<32x64xf32>
    %cst_57 = arith.constant -1.45315206 : f32
    %146 = vector.broadcast %cst_57 : f32 to vector<32x64xf32>
    %147 = arith.addf %146, %145 : vector<32x64xf32>
    %148 = arith.mulf %143, %147 : vector<32x64xf32>
    %cst_58 = arith.constant 1.42141378 : f32
    %149 = vector.broadcast %cst_58 : f32 to vector<32x64xf32>
    %150 = arith.addf %149, %148 : vector<32x64xf32>
    %151 = arith.mulf %143, %150 : vector<32x64xf32>
    %cst_59 = arith.constant -0.284496725 : f32
    %152 = vector.broadcast %cst_59 : f32 to vector<32x64xf32>
    %153 = arith.addf %152, %151 : vector<32x64xf32>
    %154 = arith.mulf %143, %153 : vector<32x64xf32>
    %cst_60 = arith.constant 0.254829586 : f32
    %155 = vector.broadcast %cst_60 : f32 to vector<32x64xf32>
    %156 = arith.addf %155, %154 : vector<32x64xf32>
    %157 = arith.mulf %143, %156 : vector<32x64xf32>
    %cst_61 = arith.constant 0.000000e+00 : f32
    %158 = vector.broadcast %cst_61 : f32 to vector<32x64xf32>
    %159 = arith.subf %158, %137 : vector<32x64xf32>
    %160 = arith.mulf %159, %137 : vector<32x64xf32>
    %161 = math.exp %160 : vector<32x64xf32>
    %162 = arith.mulf %157, %161 : vector<32x64xf32>
    %cst_62 = arith.constant 1.000000e+00 : f32
    %163 = vector.broadcast %cst_62 : f32 to vector<32x64xf32>
    %164 = arith.subf %163, %162 : vector<32x64xf32>
    %165 = arith.mulf %136, %164 : vector<32x64xf32>
    %cst_63 = arith.constant 1.000000e+00 : f32
    %166 = vector.broadcast %cst_63 : f32 to vector<32x64xf32>
    %167 = arith.addf %166, %165 : vector<32x64xf32>
    %168 = arith.mulf %129, %167 : vector<32x64xf32>
    %169 = arith.truncf %168 : vector<32x64xf32> to vector<32x64xbf16>
    %c0_64 = arith.constant 0 : index
    %c0_65 = arith.constant 0 : index
    %c0_66 = arith.constant 0 : index
    %170 = vector.load %arg11[%c0_64, %c0_65, %c0_66] : memref<1x64x32xbf16, #tpu.memory_space<vmem>>, vector<1x64x32xbf16>
    %171 = vector.shape_cast %170 : vector<1x64x32xbf16> to vector<64x32xbf16>
    %cst_67 = arith.constant dense<0.000000e+00> : vector<32x32xf32>
    %172 = tpu.matmul %169, %171, %cst_67 {dimension_numbers = #tpu.dot_dimension_numbers<[1], [0], [0], [1], [0, 0, 1, 1], [], []>} : vector<32x64xbf16>, vector<64x32xbf16>, vector<32x32xf32> -> vector<32x32xf32>
    %173 = vector.broadcast %12 : vector<1x32xf32> to vector<32x32xf32>
    %174 = arith.addf %172, %173 : vector<32x32xf32>
    %175 = arith.addf %97, %174 : vector<32x32xf32>
    %176 = vector.shape_cast %175 : vector<32x32xf32> to vector<2x16x32xf32>
    %c0_68 = arith.constant 0 : index
    %c0_69 = arith.constant 0 : index
    %c0_70 = arith.constant 0 : index
    %177 = vector.load %arg17[%c0_68, %c0_69, %c0_70] : memref<2x16x32xf32, #tpu.memory_space<vmem>>, vector<2x16x32xf32>
    tpu.vector_store %arg17[%c0_68, %c0_69, %c0_70], %176 {strides = array<i32>} : memref<2x16x32xf32, #tpu.memory_space<vmem>>, vector<2x16x32xf32>,
    %c1_i32 = arith.constant 1 : i32
    %178 = arith.cmpi eq, %arg1, %c1_i32 : i32
    %179 = arith.extui %178 : i1 to i32
    %c0_i32_71 = arith.constant 0 : i32
    %180 = arith.cmpi ne, %179, %c0_i32_71 : i32
    scf.if %180 {
      %181 = vector.shape_cast %175 : vector<32x32xf32> to vector<2x16x32xf32>
      %cst_72 = arith.constant dense<0.000000e+00> : vector<2x32xf32>
      %182 = vector.multi_reduction <add>, %181, %cst_72 [1] : vector<2x16x32xf32> to vector<2x32xf32>
      %cst_73 = arith.constant 1.600000e+01 : f32
      %183 = vector.broadcast %cst_73 : f32 to vector<2x32xf32>
      %184 = arith.divf %182, %183 : vector<2x32xf32>
      %c0_74 = arith.constant 0 : index
      %c0_75 = arith.constant 0 : index
      %185 = vector.load %arg12[%c0_74, %c0_75] : memref<1x32xf32, #tpu.memory_space<vmem>>, vector<1x32xf32>
      %c0_76 = arith.constant 0 : index
      %c0_77 = arith.constant 0 : index
      %186 = vector.load %arg13[%c0_76, %c0_77] : memref<1x32xf32, #tpu.memory_space<vmem>>, vector<1x32xf32>
      %cst_78 = arith.constant dense<0.000000e+00> : vector<2xf32>
      %187 = vector.multi_reduction <add>, %184, %cst_78 [1] : vector<2x32xf32> to vector<2xf32>
      %188 = vector.shape_cast %187 : vector<2xf32> to vector<2x1xf32>
      %cst_79 = arith.constant 3.200000e+01 : f32
      %189 = vector.broadcast %cst_79 : f32 to vector<2x1xf32>
      %190 = arith.divf %188, %189 : vector<2x1xf32>
      %191 = vector.broadcast %190 : vector<2x1xf32> to vector<2x32xf32>
      %192 = arith.subf %184, %191 : vector<2x32xf32>
      %193 = arith.mulf %192, %192 : vector<2x32xf32>
      %cst_80 = arith.constant dense<0.000000e+00> : vector<2xf32>
      %194 = vector.multi_reduction <add>, %193, %cst_80 [1] : vector<2x32xf32> to vector<2xf32>
      %195 = vector.shape_cast %194 : vector<2xf32> to vector<2x1xf32>
      %cst_81 = arith.constant 3.200000e+01 : f32
      %196 = vector.broadcast %cst_81 : f32 to vector<2x1xf32>
      %197 = arith.divf %195, %196 : vector<2x1xf32>
      %198 = vector.broadcast %190 : vector<2x1xf32> to vector<2x32xf32>
      %199 = arith.subf %184, %198 : vector<2x32xf32>
      %cst_82 = arith.constant 9.99999974E-6 : f32
      %200 = vector.broadcast %cst_82 : f32 to vector<2x1xf32>
      %201 = arith.addf %197, %200 : vector<2x1xf32>
      %202 = math.rsqrt %201 : vector<2x1xf32>
      %203 = vector.broadcast %202 : vector<2x1xf32> to vector<2x32xf32>
      %204 = arith.mulf %199, %203 : vector<2x32xf32>
      %205 = vector.broadcast %185 : vector<1x32xf32> to vector<2x32xf32>
      %206 = arith.mulf %204, %205 : vector<2x32xf32>
      %207 = vector.broadcast %186 : vector<1x32xf32> to vector<2x32xf32>
      %208 = arith.addf %206, %207 : vector<2x32xf32>
      %209 = arith.truncf %208 : vector<2x32xf32> to vector<2x32xbf16>
      %c0_83 = arith.constant 0 : index
      %c0_84 = arith.constant 0 : index
      %210 = vector.load %arg14[%c0_83, %c0_84] : memref<32x128xbf16, #tpu.memory_space<vmem>>, vector<32x128xbf16>
      %cst_85 = arith.constant dense<0.000000e+00> : vector<2x128xf32>
      %211 = tpu.matmul %209, %210, %cst_85 {dimension_numbers = #tpu.dot_dimension_numbers<[1], [0], [0], [1], [0, 0, 1, 1], [], []>} : vector<2x32xbf16>, vector<32x128xbf16>, vector<2x128xf32> -> vector<2x128xf32>
      %c0_86 = arith.constant 0 : index
      %c0_87 = arith.constant 0 : index
      %212 = vector.load %arg15[%c0_86, %c0_87] : memref<1x128xf32, #tpu.memory_space<vmem>>, vector<1x128xf32>
      %213 = vector.broadcast %212 : vector<1x128xf32> to vector<2x128xf32>
      %214 = arith.addf %211, %213 : vector<2x128xf32>
      %c0_88 = arith.constant 0 : index
      %c0_89 = arith.constant 0 : index
      %c0_90 = arith.constant 0 : index
      %215 = vector.load %arg16[%c0_88, %c0_89, %c0_90] : memref<2x1x128xf32, #tpu.memory_space<vmem>>, vector<2x1x128xf32>
      %216 = vector.shape_cast %215 : vector<2x1x128xf32> to vector<2x128xf32>
      %217 = vector.shape_cast %214 : vector<2x128xf32> to vector<2x1x128xf32>
      tpu.vector_store %arg16[%c0_88, %c0_89, %c0_90], %217 {strides = array<i32>} : memref<2x1x128xf32, #tpu.memory_space<vmem>>, vector<2x1x128xf32>,
    } else {
    }
    return
  }
  func.func @transform_0(%arg0: i32, %arg1: i32) -> (i32, i32, i32) {
    %c0_i32 = arith.constant 0 : i32
    %c0_i32_0 = arith.constant 0 : i32
    %c0_i32_1 = arith.constant 0 : i32
    return %arg0, %c0_i32, %c0_i32_0 : i32, i32, i32
  }
  func.func @transform_1(%arg0: i32, %arg1: i32) -> (i32, i32) {
    %c0_i32 = arith.constant 0 : i32
    %c0_i32_0 = arith.constant 0 : i32
    %c0_i32_1 = arith.constant 0 : i32
    return %c0_i32, %c0_i32_0 : i32, i32
  }
  func.func @transform_2(%arg0: i32, %arg1: i32) -> (i32, i32) {
    %c0_i32 = arith.constant 0 : i32
    %c0_i32_0 = arith.constant 0 : i32
    %c0_i32_1 = arith.constant 0 : i32
    return %c0_i32, %c0_i32_0 : i32, i32
  }
  func.func @transform_3(%arg0: i32, %arg1: i32) -> (i32, i32, i32) {
    %c0_i32 = arith.constant 0 : i32
    %c0_i32_0 = arith.constant 0 : i32
    %c0_i32_1 = arith.constant 0 : i32
    %c0_i32_2 = arith.constant 0 : i32
    return %c0_i32, %c0_i32_0, %c0_i32_1 : i32, i32, i32
  }
  func.func @transform_4(%arg0: i32, %arg1: i32) -> (i32, i32, i32) {
    %c0_i32 = arith.constant 0 : i32
    %c0_i32_0 = arith.constant 0 : i32
    %c0_i32_1 = arith.constant 0 : i32
    return %arg1, %c0_i32, %c0_i32_0 : i32, i32, i32
  }
  func.func @transform_5(%arg0: i32, %arg1: i32) -> (i32, i32, i32) {
    %c0_i32 = arith.constant 0 : i32
    %c0_i32_0 = arith.constant 0 : i32
    %c0_i32_1 = arith.constant 0 : i32
    return %arg1, %c0_i32, %c0_i32_0 : i32, i32, i32
  }
  func.func @transform_6(%arg0: i32, %arg1: i32) -> (i32, i32, i32) {
    %c0_i32 = arith.constant 0 : i32
    %c0_i32_0 = arith.constant 0 : i32
    %c0_i32_1 = arith.constant 0 : i32
    return %arg1, %c0_i32, %c0_i32_0 : i32, i32, i32
  }
  func.func @transform_7(%arg0: i32, %arg1: i32) -> (i32, i32, i32) {
    %c0_i32 = arith.constant 0 : i32
    %c0_i32_0 = arith.constant 0 : i32
    %c0_i32_1 = arith.constant 0 : i32
    return %arg1, %c0_i32, %c0_i32_0 : i32, i32, i32
  }
  func.func @transform_8(%arg0: i32, %arg1: i32) -> (i32, i32, i32) {
    %c0_i32 = arith.constant 0 : i32
    %c0_i32_0 = arith.constant 0 : i32
    %c0_i32_1 = arith.constant 0 : i32
    return %arg1, %c0_i32, %c0_i32_0 : i32, i32, i32
  }
  func.func @transform_9(%arg0: i32, %arg1: i32) -> (i32, i32, i32) {
    %c0_i32 = arith.constant 0 : i32
    %c0_i32_0 = arith.constant 0 : i32
    %c0_i32_1 = arith.constant 0 : i32
    return %arg1, %c0_i32, %c0_i32_0 : i32, i32, i32
  }
  func.func @transform_10(%arg0: i32, %arg1: i32) -> (i32, i32) {
    %c0_i32 = arith.constant 0 : i32
    %c0_i32_0 = arith.constant 0 : i32
    %c0_i32_1 = arith.constant 0 : i32
    return %c0_i32, %c0_i32_0 : i32, i32
  }
  func.func @transform_11(%arg0: i32, %arg1: i32) -> (i32, i32) {
    %c0_i32 = arith.constant 0 : i32
    %c0_i32_0 = arith.constant 0 : i32
    %c0_i32_1 = arith.constant 0 : i32
    return %c0_i32, %c0_i32_0 : i32, i32
  }
  func.func @transform_12(%arg0: i32, %arg1: i32) -> (i32, i32) {
    %c0_i32 = arith.constant 0 : i32
    %c0_i32_0 = arith.constant 0 : i32
    %c0_i32_1 = arith.constant 0 : i32
    return %c0_i32, %c0_i32_0 : i32, i32
  }
  func.func @transform_13(%arg0: i32, %arg1: i32) -> (i32, i32) {
    %c0_i32 = arith.constant 0 : i32
    %c0_i32_0 = arith.constant 0 : i32
    %c0_i32_1 = arith.constant 0 : i32
    return %c0_i32, %c0_i32_0 : i32, i32
  }
  func.func @transform_14(%arg0: i32, %arg1: i32) -> (i32, i32, i32) {
    %c0_i32 = arith.constant 0 : i32
    %c0_i32_0 = arith.constant 0 : i32
    %c0_i32_1 = arith.constant 0 : i32
    return %arg0, %c0_i32, %c0_i32_0 : i32, i32, i32
  }
}

</mosaic_0001>

<bundles_post_ra>
// kernel: tpu_custom_call.1
= control target key start
LH: loop header
LB: loop body
LE: loop exit
PB: predicated region body
PF: predicated region fallthrough
CT: control target
= control target key end

     0   :  { %s3433_s0 = inlined_call_operand.vmem [shape: bf16[2,16,64], index: 0, kind: input, shape index: {}]   ;;  %s3434_s1 = inlined_call_operand.vmem [shape: bf16[64,32], index: 1, kind: input, shape index: {}]   ;;  %s3435_s2 = inlined_call_operand.vmem [shape: f32[1,32], index: 2, kind: input, shape index: {}]   ;;  %s3436_s3 = inlined_call_operand.vmem [shape: f32[1,16,32], index: 3, kind: input, shape index: {}]   ;;  %s3437_s4 = inlined_call_operand.vmem [shape: f32[2,6,32], index: 4, kind: input, shape index: {}]   ;;  %s3438_s5 = inlined_call_operand.vmem [shape: bf16[2,32,96], index: 5, kind: input, shape index: {}]   ;;  %s3439_s6 = inlined_call_operand.vmem [shape: bf16[2,32,32], index: 6, kind: input, shape index: {}]   ;;  %s3440_s7 = inlined_call_operand.vmem [shape: bf16[2,32,64], index: 7, kind: input, shape index: {}]   ;;  %s3441_s8 = inlined_call_operand.hbm [shape: f32[2,1,64], index: 8, kind: input, shape index: {}]   ;;  %s3442_s9 = inlined_call_operand.vmem [shape: bf16[2,64,32], index: 9, kind: input, shape index: {}]   ;;  %s3443_s10 = inlined_call_operand.hbm [shape: f32[1,32], index: 10, kind: input, shape index: {}]   ;;  %s3444_s11 = inlined_call_operand.hbm [shape: f32[1,32], index: 11, kind: input, shape index: {}]   ;;  %s3445_s12 = inlined_call_operand.vmem [shape: bf16[32,128], index: 12, kind: input, shape index: {}]   ;;  %s3446_s13 = inlined_call_operand.hbm [shape: f32[1,128], index: 13, kind: input, shape index: {}]   ;;  %s3447_s14 = inlined_call_operand.hbm [shape: f32[2,1,128], index: 14, kind: output, shape index: {}]  }
   0x1   :  { %3455 = sst [smem:[#allocation20_spill]] %s3441_s8 }
   0x2   :  { %3456 = sst [smem:[#allocation21_spill]] %s3443_s10 }
   0x3   :  { %3457 = sst [smem:[#allocation22_spill]] %s3444_s11 }
   0x4   :  { %3458 = sst [smem:[#allocation23_spill]] %s3445_s12 }
   0x5   :  { %3459 = sst [smem:[#allocation24_spill]] %s3446_s13 }
   0x6   :  { %3460 = sst [smem:[#allocation25_spill]] %s3447_s14 }
   0x7   :  { %19 = vsyncpa [#allocation5], 0 }
   0x8   :  { %21 = vsyncpa [#allocation5 + $0x1], 0 }
   0x9   :  { %22 = vsyncpa [#allocation8], 0 }
   0xa   :  { %23 = vsyncpa [#allocation11], 0 }
   0xb   :  { %24 = vsyncpa [#allocation6], 0  ;;  %s2968_s29 = smov 0   ;;  %s2970_s30 = smov 0  }
   0xc   :  { %s2972_s15 = smov 0   ;;  %s2974_s16 = smov 0  }
   0xd   :  { %s2976_s17 = smov 0   ;;  %s2978_s18 = smov 0  }
   0xe LB: > { %3461 = sst [smem:[#allocation17_spill]] %s2869_s17  ;;  %s3448_s19 = sadd.s32 4294967295, %s2873_s18   ;;  %s2873_s18 = sphi %s2978_s18, %s30_s18   ;;  %s2869_s17 = sphi %s2976_s17, %s3481_s17   ;;  %s2865_s16 = sphi %s2974_s16, %s3480_s16   ;;  %s2861_s15 = sphi %s2972_s15, %s3484_s15   ;;  %s2857_s30 = sphi %s2970_s30, %s3483_s30   ;;  %s2853_s29 = sphi %s2968_s29, %s3482_s29  }
   0xf   : > { %p255_p0 = scmp.ne.s32.totalorder %s2857_s30, %s2853_s29  ;;  %p3000_p1 = scmp.eq.s32.totalorder %s3448_s19, 0 }
  0x10   : > { %p2261_p2 = scmp.ge.s32.totalorder %s2873_s18, 1  ;;  %p402_p3 = scmp.lt.s32.totalorder %s2873_s18, 3 }
  0x11   : > { %s3462_s20 = scalar_select %p3000_p1, 1, 0 }
  0x12   : > { %p3008_p4 = por %p3000_p1, %p255_p0  ;;  %p3012_p5 = pnand %p2261_p2, %p402_p3 }
  0x13   : > { %s2875_s23 = smov [#allocation7]   ;;  %s2876_s25 = smov [#allocation9]  }
  0x14   : > { %s3463_s21 = scalar_select %p3008_p4, 1, 0 }
  0x15   : > { %s434_s24 = sshll.u32 %s2875_s23, 4  ;;  %p2506_p6 = pneg %p3012_p5  ;;  %s435_s24 = int_to_ptr.vmem [resolvable:$true] %s434_s24 }
  0x16   : > { %s445_s26 = sshll.u32 %s2876_s25, 4  ;;  %s2877_s28 = smov [#allocation10]   ;;  %s446_s26 = int_to_ptr.vmem [resolvable:$true] %s445_s26 }
  0x17   : > { %p3020_p7 = pnand %p2506_p6, %p3000_p1  ;;  %s459_s29 = sshll.u32 %s2877_s28, 4  ;;  %s3024_s29 = int_to_ptr.vmem [resolvable:$true] %s459_s29 }
  0x18   : > { %s2692_s23 = scalar_lea.vmem %s435_s24, 16  ;;  %s2699_s25 = scalar_lea.vmem %s435_s24, 32 }
  0x19   : > { %p2683_p8 = pneg %p3020_p7  ;;  %p2693_p9 = scmp.ne.s32.totalorder %s435_s24, %s2692_s23 }
  0x1a   : > { %p2700_p12 = scmp.lt.s32.totalorder %s435_s24, %s435_s24  ;;  %p2701_p13 = scmp.lt.s32.totalorder %s2699_s25, %s2692_s23 }
  0x1b   : > { %p2695_p10 = pnand %p2693_p9, %p2683_p8 }
  0x1c   : > { %p2702_p0 = por %p2701_p13, %p2700_p12 }
  0x1d   : > { %p2696_p11 = pneg %p2695_p10 }
  0x1f   : > { %p2703_p2 = pnand %p2702_p0, %p2696_p11 }
  0x21   : > { %2706 = shalt.err (!%p2703_p2)
}
  0x22   : > { %s3466_s10 = sld [smem:[#allocation21_spill]]  ;;  %s2718_s14 = scalar_lea.vmem %s446_s26, 16 }
  0x23   : > { %p2719_p3 = scmp.ne.s32.totalorder %s446_s26, %s2718_s14  ;;  %s2725_s12 = scalar_lea.vmem %s446_s26, 32 }
  0x24   : > { %p2726_p10 = scmp.lt.s32.totalorder %s446_s26, %s446_s26  ;;  %p2727_p1 = scmp.lt.s32.totalorder %s2725_s12, %s2718_s14 }
  0x25   : > { %p2721_p6 = pnand %p2719_p3, %p2683_p8 }
  0x26   : > { %p2728_p4 = por %p2727_p1, %p2726_p10 }
  0x27   : > { %p2722_p9 = pneg %p2721_p6 }
  0x28   : > { %2509 = dma.hbm_to_vmem [thread:$0]  (!%p3020_p7), %s3466_s10, 16, %s435_s24, [#allocation8]  }
  0x29   : > { %p2729_p12 = pnand %p2728_p4, %p2722_p9 }
  0x2b   : > { %2732 = shalt.err (!%p2729_p12)
}
  0x2c   : > { %s3467_s11 = sld [smem:[#allocation22_spill]]  ;;  %s2744_s19 = scalar_lea.vmem %s3024_s29, 16 }
  0x2d   : > { %p2745_p11 = scmp.ne.s32.totalorder %s3024_s29, %s2744_s19  ;;  %s2751_s12 = scalar_lea.vmem %s3024_s29, 32 }
  0x2e   : > { %p2752_p1 = scmp.lt.s32.totalorder %s3024_s29, %s3024_s29  ;;  %p2753_p4 = scmp.lt.s32.totalorder %s2751_s12, %s2744_s19 }
  0x2f   : > { %p2747_p13 = pnand %p2745_p11, %p2683_p8 }
  0x30   : > { %p2754_p2 = por %p2753_p4, %p2752_p1 }
  0x31   : > { %p2748_p0 = pneg %p2747_p13 }
  0x32   : > { %2512 = dma.hbm_to_vmem [thread:$0]  (!%p3020_p7), %s3467_s11, 16, %s446_s26, [#allocation8]  }
  0x33   : > { %p2755_p3 = pnand %p2754_p2, %p2748_p0 }
  0x35   : > { %2758 = shalt.err (!%p2755_p3)
}
  0x36   : > { %s3468_s13 = sld [smem:[#allocation24_spill]]  ;;  %s242_s26 = sadd.s32 1, %s2861_s15 }
  0x37   : > { %s39_s28 = sadd.s32 1, %s2869_s17  ;;  %p249_p8 = scmp.ne.s32.totalorder %s2861_s15, %s2857_s30 }
  0x38   : > { %p40_p6 = scmp.ge.s32.totalorder %s39_s28, 2  ;;  %p250_p9 = scmp.eq.s32.totalorder %s2873_s18, 0 }
  0x39   : > { %p2523_p10 = scmp.lt.s32.totalorder %s2873_s18, 2  ;;  %s501_s27 = sand.u32 1, %s2861_s15  }
  0x3a   : > { %s3486_s28 = smov (%p40_p6, %s39_s28), 0  ;;  %p251_p12 = por %p250_p9, %p249_p8 }
  0x3b   : > { %3469 = sst [smem:[#allocation18_spill]] %s3486_s28  ;;  %s239_s23 = ssub.s32 %s2869_s17, %s3486_s28 }
  0x3c   : > { %2515 = dma.hbm_to_vmem [thread:$0]  (!%p3020_p7), %s3468_s13, 16, %s3024_s29, [#allocation11]  }
  0x3d   : > { %p240_p11 = scmp.eq.s32.totalorder %s239_s23, 0  ;;  %s2267_s25 = sshll.u32 %s2869_s17, 4 }
  0x3e   : > { %s3470_s8 = sld [smem:[#allocation20_spill]]  ;;  %s504_s29 = scalar_lea.vmem [#allocation4], %s501_s27 }
  0x3f   : > { %s511_s24 = sshll.u32 %s504_s29, 4  ;;  %p3076_p7 = pnand %p2523_p10, %p251_p12  ;;  %s512_s24 = int_to_ptr.vmem [resolvable:$true] %s511_s24 }
  0x40   : > { %s3074_s10 = scalar_select %p240_p11, %s2861_s15, %s242_s26  }
  0x41   : > { %s502_s13 = scalar_lea.sflag [#allocation5], %s501_s27  ;;  %p2761_p13 = pneg %p3076_p7 }
  0x42   : > { %3471 = sst [smem:[#allocation19_spill]] %s3074_s10  ;;  %s2772_s28 = scalar_lea.vmem %s512_s24, 16 }
  0x43   : > { %p2773_p0 = scmp.ne.s32.totalorder %s512_s24, %s2772_s28  ;;  %s2878_s23 = smov [#allocation4]  }
  0x44   : > { %s509_s14 = scalar_lea.hbm %s3470_s8, %s2267_s25  ;;  %s2777_s19 = sshll.u32 %s2878_s23, 4  ;;  %s2778_s19 = int_to_ptr.vmem [resolvable:$false] %s2777_s19 }
  0x45   : > { %p2775_p1 = pnand %p2773_p0, %p2761_p13  ;;  %s2779_s25 = scalar_lea.vmem %s2778_s19, 32 }
  0x46   : > { %p2780_p2 = scmp.lt.s32.totalorder %s512_s24, %s2778_s19  ;;  %p2781_p3 = scmp.lt.s32.totalorder %s2779_s25, %s2772_s28 }
  0x47   : > { %p2776_p4 = pneg %p2775_p1 }
  0x48   : > { %p2782_p8 = por %p2781_p3, %p2780_p2 }
  0x4a   : > { %p2783_p6 = pnand %p2782_p8, %p2776_p4 }
  0x4c   : > { %2786 = shalt.err (!%p2783_p6)
}
  0x4d   : > { %2519 = dma.hbm_to_vmem [thread:$0]  (!%p3076_p7), %s509_s14, 16, %s512_s24, %s502_s13  }
  0x4e   : > { %528 = sbr.rel (%p3012_p5) target bundleno = 3885 (0xf2d), region = 76  ;;  %s530_s26 = sand.u32 (!%p3012_p5), 1, %s2857_s30  }
  0x4f   : > { %s531_s27 = scalar_lea.sflag (!%p3012_p5), [#allocation5], %s530_s26  ;;  %s3087_s12 = scalar_lea.vmem (!%p3012_p5), [#allocation4], %s530_s26 }
  0x50   : > { %p3473_p9 = scmp.ne.s32.totalorder (!%p3012_p5), %s3463_s21, 0 }
  0x53   : > { %2836 = dma.done.wait (%p3473_p9), %s531_s27, 16  }
  0x54   : > { %2838 = vsyncadd (%p3473_p9), %s531_s27, 4294967280  ;;  %p3474_p10 = scmp.ne.s32.totalorder %s3462_s20, 0 }
  0x56   : > { %2840 = dma.done.wait (%p3474_p10), [#allocation8], 32  }
  0x57   : > { %2842 = vsyncadd (%p3474_p10), [#allocation8], 4294967264 }
  0x58   : > { %2844 = dma.done.wait (%p3474_p10), [#allocation11], 16  }
  0x59   : > { %2846 = vsyncadd (%p3474_p10), [#allocation11], 4294967280  ;;  %p621_p5 = scmp.lt.s32.totalorder %s2865_s16, 1  ;;  %p2281_p12 = scmp.ne.s32.totalorder %s2865_s16, 0 }
  0x5b   : > { %s622_s11 = scalar_select %p621_p5, %s2865_s16, 1 }
  0x5d   : > { %s2272_s13 = sshll.u32 %s622_s11, 3  ;;  %s2337_s22 = sshll.u32 %s622_s11, 4 }
  0x5e   : > { %s3106_s14 = scalar_lea.vmem %s3437_s4, %s2272_s13  ;;  %s3111_s23 = scalar_lea.vmem %s3438_s5, %s2337_s22 }
  0x5f   : > { %s3116_s20 = scalar_lea.vmem %s3439_s6, %s2337_s22  ;;  %s3121_s8 = scalar_lea.vmem %s3440_s7, %s2337_s22 }
  0x60   : > { %s2340_s17 = sshll.u32 %s622_s11, 5  ;;  %650 = sbr.rel (%p2281_p12) target bundleno = 322 (0x142), region = 96 }
  0x61   : > { %s3126_s13 = scalar_lea.vmem %s3442_s9, %s2340_s17 }
  0x65   : > { %v2594_v0 = vld [vmem:[%s3434_s1 + $0x18] sm:$0xff]   ;;  %v2595_v1 = vld [vmem:[%s3434_s1 + $0x10] sm:$0xff]   ;;  %v2596_v2 = vld [vmem:[%s3434_s1 + $0x8] sm:$0xff]   ;;  %vm704_vm0 = vcmask 523264   ;;  %vm766_vm1 = vcmask 261120  }
  0x66   : > { %2384 = vmatprep.subr.bf16.mxu0 %v2594_v0  ;;  %v2598_v3 = vld [vmem:[%s3433_s0] sm:$0xff]   ;;  %v2599_v5 = vld [vmem:[%s3433_s0 + $0x8] sm:$0xff]  }
  0x67   : > { %2385 = vmatpush3.bf16.msra.mxu0 %v2594_v0  ;;  %2392 = vmatprep.mubr.msk.bf16.mxu0 %vm704_vm0, %v2598_v3  ;;  %v2597_v4 = vld [vmem:[%s3434_s1] sm:$0xff]   ;;  %v761_v14 = vld [vmem:[%s3436_s3 + $0x8] sm:$0xff] }
  0x68   : > { %2386 = vmatprep.subr.bf16.mxu0 %v2595_v1  ;;  %v2282_v6 = vld [vmem:[%s3435_s2] ss:$0 sm:$0xff] }
  0x69   : > { %v760_v8 = vld [vmem:[%s3436_s3] sm:$0xff] }
  0x6b   : > { %2387 = vmatpush3.bf16.msra.mxu0 %v2595_v1 }
  0x6c   : > { %2388 = vmatprep.subr.bf16.mxu0 %v2596_v2 }
  0x6f   : > { %2389 = vmatpush3.bf16.msra.mxu0 %v2596_v2 }
  0x70   : > { %2390 = vmatprep.subr.bf16.mxu0 %v2597_v4 }
  0x73   : > { %2391 = vmatpush3.bf16.msra.mxu0 %v2597_v4 }
  0x76   : > { %2393 = vmatmul.mubr.msk.bf16.vlgmr.msra.gmra.mxu0 %vm704_vm0, %v2599_v5 }
 0x136   : > { %v2394_v7 = vpop.f32.mrf.mxu0 }
 0x137   : > { %v754_v9 = vadd.f32 %v2394_v7, %v2282_v6 }
 0x138   : > { %v745_v10 = vpop.f32.mrf.mxu0 }
 0x139   : > { %v764_v11 = vadd.f32 %v760_v8, %v754_v9  ;;  %v746_v12 = vadd.f32 %v2282_v6, %v745_v10 }
 0x13a   : > { %v2395_v13 = vpop.f32.mrf.mxu0 }
 0x13b   : > { %769 = vst.msk [vmem:[#allocation2 + $0x10] sm:$0xff] %vm766_vm1, %v764_v11  ;;  %v762_v15 = vadd.f32 %v760_v8, %v746_v12  ;;  %v757_v16 = vadd.f32 %v2395_v13, %v2282_v6 }
 0x13c   : > { %v748_v17 = vpop.f32.mrf.mxu0 }
 0x13d   : > { %767 = vst.msk [vmem:[#allocation2] sm:$0xff] %vm766_vm1, %v762_v15  ;;  %v765_v18 = vadd.f32 %v761_v14, %v757_v16  ;;  %v749_v19 = vadd.f32 %v2282_v6, %v748_v17 }
 0x13f   : > { %770 = vst.msk [vmem:[#allocation2 + $0x18] sm:$0xff] %vm766_vm1, %v765_v18  ;;  %v763_v20 = vadd.f32 %v761_v14, %v749_v19 }
 0x141   : > { %768 = vst.msk [vmem:[#allocation2 + $0x8] sm:$0xff] %vm766_vm1, %v763_v20 }
 0x142 PF: > { %vm776_vm2 = vcmask 261120   ;;  %v3158_v22 = vld [vmem:[#allocation2 + $0x10] sm:$0xff]  ;;  %v2600_v49 = vld [vmem:[%s3111_s23 + $0x8] sm:$0xff]   ;;  %v2601_v50 = vld [vmem:[%s3111_s23] sm:$0xff]   ;;  %v830_v60 = vlaneseq  ;;  %vm2880_vm3 = vmmov 0   ;;  %s2881_s23 = smov 96  }
 0x143   : > { %v783_v25 = vsel %vm776_vm2, %v3158_v22, 0.0  ;;  %2396 = vmatprep.subr.bf16.mxu0 %v2600_v49  ;;  %v3186_v2 = vld [vmem:[%s3106_s14] sm:$0x3f]  ;;  %vm930_vm4 = vcmask 130048   ;;  %s2882_s10 = smov 64   ;;  %s2883_s17 = smov 80  }
 0x144   : > { %v3156_v21 = vld [vmem:[#allocation2] sm:$0xff]  ;;  %784 = vadd.xlane.f32.xlu1 %v783_v25  ;;  %2397 = vmatpush3.bf16.msra.mxu0 %v2600_v49  ;;  %v3182_v0 = vshrl.u32 %v830_v60, 7  ;;  %s2884_s25 = smov 112   ;;  %s2885_s26 = smov 48   ;;  %vm1450_vm5 = vcmask 257024   ;;  %vm1842_vm10 = vcmask 523264  }
 0x145   : > { %v777_v24 = vsel %vm776_vm2, %v3156_v21, 0.0  ;;  %2398 = vmatprep.subr.bf16.mxu0 %v2601_v50  ;;  %s2886_s27 = smov 16   ;;  %p2324_p11 = scmp.ne.s32.totalorder %s2865_s16, 1 }
 0x146   : > { %v3166_v26 = vld [vmem:[#allocation2 + $0x18] sm:$0xff]  ;;  %778 = vadd.xlane.f32.xlu0 %v777_v24  ;;  %v832_v1 = vsub.s32 0, %v3182_v0  ;;  %v840_v6 = vsub.s32 1, %v3182_v0 }
 0x147   : > { %v786_v28 = vsel %vm776_vm2, %v3166_v26, 0.0 }
 0x148   : > { %v3160_v23 = vld [vmem:[#allocation2 + $0x8] sm:$0xff]  ;;  %787 = vadd.xlane.f32.xlu1 %v786_v28  ;;  %2399 = vmatpush3.bf16.msra.mxu0 %v2601_v50  ;;  %v833_v5 = vrot.slane %v3186_v2, %v832_v1  ;;  %v841_v11 = vrot.slane %v3186_v2, %v840_v6  ;;  %v2879_v28 = vmov 0.0  }
 0x149   : > { %v780_v27 = vsel %vm776_vm2, %v3160_v23, 0.0  ;;  %2410 = vmatprep.subr.bf16.mxu0 %v2879_v28  ;;  %2404 = vmatprep.subr.bf16.mxu1 %v2879_v28 }
 0x14a   : > { %781 = vadd.xlane.f32.xlu0 %v780_v27  ;;  %2406 = vmatprep.mubr.msk.bf16.mxu1 %vm2880_vm3, %v2879_v28 }
 0x1cd   : > { %v785_v30 = vpop.xlane.xlu1 %784 }
 0x1ce   : > { %v792_v32 = vmul.f32 0.03125, %v785_v30 }
 0x1cf   : > { %v779_v29 = vpop.xlane.xlu0 %778 }
 0x1d0   : > { %v790_v31 = vmul.f32 0.03125, %v779_v29  ;;  %v796_v34 = vsub.f32 %v3158_v22, %v792_v32 }
 0x1d1   : > { %v788_v36 = vpop.xlane.xlu1 %787 }
 0x1d2   : > { %v794_v33 = vsub.f32 %v3156_v21, %v790_v31  ;;  %v793_v38 = vmul.f32 0.03125, %v788_v36  ;;  %v800_v40 = vmul.f32 %v796_v34, %v796_v34 }
 0x1d3   : > { %v782_v35 = vpop.xlane.xlu0 %781 }
 0x1d4   : > { %v791_v37 = vmul.f32 0.03125, %v782_v35  ;;  %v798_v39 = vmul.f32 %v794_v33, %v794_v33  ;;  %v797_v42 = vsub.f32 %v3166_v26, %v793_v38  ;;  %v808_v44 = vsel %vm776_vm2, %v800_v40, 0.0 }
 0x1d6   : > { %v795_v41 = vsub.f32 %v3160_v23, %v791_v37  ;;  %v802_v43 = vsel %vm776_vm2, %v798_v39, 0.0  ;;  %v801_v46 = vmul.f32 %v797_v42, %v797_v42 }
 0x1d7   : > { %803 = vadd.xlane.f32.xlu0 %v802_v43 }
 0x1d8   : > { %v799_v45 = vmul.f32 %v795_v41, %v795_v41  ;;  %v811_v48 = vsel %vm776_vm2, %v801_v46, 0.0 }
 0x1da   : > { %v805_v47 = vsel %vm776_vm2, %v799_v45, 0.0 }
 0x1db   : > { %809 = vadd.xlane.f32.xlu0 %v808_v44  ;;  %806 = vadd.xlane.f32.xlu1 %v805_v47 }
 0x1df   : > { %812 = vadd.xlane.f32.xlu1 %v811_v48 }
 0x260   : > { %v804_v51 = vpop.xlane.xlu0 %803 }
 0x261   : > { %v814_v52 = vmul.f32 0.03125, %v804_v51 }
 0x263   : > { %v818_v53 = vadd.f32 1e-05, %v814_v52 }
 0x264   : > { %v807_v54 = vpop.xlane.xlu1 %806  ;;  %v810_v55 = vpop.xlane.xlu0 %809 }
 0x265   : > { %2612 = vrsqrt.f32 %v818_v53  ;;  %v815_v56 = vmul.f32 0.03125, %v807_v54  ;;  %v816_v57 = vmul.f32 0.03125, %v810_v55 }
 0x267   : > { %v819_v58 = vadd.f32 1e-05, %v815_v56  ;;  %v820_v59 = vadd.f32 1e-05, %v816_v57 }
 0x268   : > { %v813_v61 = vpop.xlane.xlu1 %812 }
 0x269   : > { %2614 = vrsqrt.f32 %v819_v58  ;;  %v817_v62 = vmul.f32 0.03125, %v813_v61 }
 0x26a   : > { %2616 = vrsqrt.f32 %v820_v59 }
 0x26b   : > { %v821_v63 = vadd.f32 1e-05, %v817_v62 }
 0x26d   : > { %2618 = vrsqrt.f32 %v821_v63 }
 0x272   : > { %v2613_v3 = vpop.eup %2612 }
 0x273   : > { %v826_v4 = vmul.f32 %v2613_v3, %v794_v33 }
 0x275   : > { %v834_v10 = vmul.f32 %v833_v5, %v826_v4 }
 0x276   : > { %v2615_v7 = vpop.eup %2614 }
 0x277   : > { %v2617_v8 = vpop.eup %2616  ;;  %v827_v9 = vmul.f32 %v2615_v7, %v795_v41  ;;  %v842_v15 = vadd.f32 %v841_v11, %v834_v10 }
 0x278   : > { %v828_v12 = vmul.f32 %v2617_v8, %v796_v34 }
 0x279   : > { %v835_v13 = vmul.f32 %v833_v5, %v827_v9 }
 0x27a   : > { %v2619_v14 = vpop.eup %2618  ;;  %v836_v18 = vmul.f32 %v833_v5, %v828_v12 }
 0x27b   : > { %v843_v16 = vadd.f32 %v841_v11, %v835_v13  ;;  %v829_v17 = vmul.f32 %v2619_v14, %v797_v42 }
 0x27c   : > { %v844_v24 = vadd.f32 %v841_v11, %v836_v18 }
 0x27d   : > { %v846_v19 = vpack.c.bf16 %v843_v16, %v842_v15  ;;  %v837_v20 = vmul.f32 %v833_v5, %v829_v17 }
 0x27f   : > { %2400 = vmatprep.mubr.msk.bf16.mxu0 %vm776_vm2, %v846_v19  ;;  %v845_v25 = vadd.f32 %v841_v11, %v837_v20 }
 0x281   : > { %v847_v27 = vpack.c.bf16 %v845_v25, %v844_v24 }
 0x283   : > { %2401 = vmatmul.mubr.msk.bf16.vlgmr.msra.gmra.mxu0 %vm776_vm2, %v847_v27 }
 0x284   : > { %2412 = vmatprep.mubr.msk.bf16.mxu0 %vm2880_vm3, %v2879_v28 }
 0x343   : > { %v2402_v29 = vpop.f32.mrf.mxu0 }
 0x344   : > { %v921_v32 = vmul.f32 0.25, %v2402_v29 }
 0x345   : > { %v904_v30 = vpop.f32.mrf.mxu0 }
 0x346   : > { %v919_v43 = vmul.f32 0.25, %v904_v30 }
 0x347   : > { %v2403_v31 = vpop.f32.mrf.mxu0 }
 0x348   : > { %v922_v33 = vmul.f32 0.25, %v2403_v31  ;;  %v3199_v34 = vpack.c.bf16 %v2403_v31, %v2402_v29 }
 0x349   : > { %v907_v35 = vpop.f32.mrf.mxu0 }
 0x34a   : > { %v3201_v36 = vpack.c.bf16 %v922_v33, %v921_v32  ;;  %v3203_v37 = vpack.c.bf16 %v907_v35, %v904_v30  ;;  %979 = vrot.lane.b32.xlu1 %v3199_v34, %s2881_s23  ;;  %v920_v42 = vmul.f32 0.25, %v907_v35 }
 0x34c   : > { %928 = vrot.lane.b32.xlu0 %v3203_v37, %s2881_s23  ;;  %v3211_v44 = vpack.c.bf16 %v920_v42, %v919_v43 }
 0x3bc   : > { %v980_v38 = vpop.permute.xlu1 %979 }
 0x3bd   : > { %v985_v39 = vsel %vm930_vm4, %v980_v38, 0 }
 0x3be   : > { %2411 = vmatpush3.bf16.xpose.msra.mxu0 %v985_v39  ;;  %v929_v40 = vpop.permute.xlu0 %928 }
 0x3bf   : > { %v935_v41 = vsel %vm930_vm4, %v929_v40, 0  ;;  %2422 = vmatprep.subr.bf16.mxu0 %v2879_v28 }
 0x3c0   : > { %2405 = vmatpush3.bf16.xpose.msra.mxu1 %v935_v41 }
 0x3c1   : > { %2416 = vmatprep.subr.bf16.mxu1 %v2879_v28 }
 0x3c5   : > { %2413 = vmatmul.mubr.msk.bf16.vlgmr.msra.gmra.mxu0 %vm930_vm4, %v3201_v36 }
 0x3c6   : > { %2424 = vmatprep.mubr.msk.bf16.mxu0 %vm2880_vm3, %v2879_v28 }
 0x3c7   : > { %2407 = vmatmul.mubr.msk.bf16.vlgmr.msra.gmra.mxu1 %vm930_vm4, %v3211_v44 }
 0x3c8   : > { %2418 = vmatprep.mubr.msk.bf16.mxu1 %vm2880_vm3, %v2879_v28 }
 0x485   : > { %v1021_v45 = vpop.f32.mrf.mxu0 }
 0x486   : > { %v1030_v57 = vmax.f32 %v1021_v45, 0.0 }
 0x487   : > { %v971_v46 = vpop.f32.mrf.mxu1  ;;  %v2414_v47 = vpop.f32.mrf.mxu0 }
 0x488   : > { %v1028_v48 = vmax.f32 %v971_v46, 0.0  ;;  %v1038_v60 = vsel %vm930_vm4, %v1030_v57, -inf }
 0x489   : > { %v2408_v49 = vpop.f32.mrf.mxu1  ;;  %v1024_v50 = vpop.f32.mrf.mxu0 }
 0x48a   : > { %v1031_v51 = vmax.f32 %v1024_v50, 0.0  ;;  %v1032_v52 = vsel %vm930_vm4, %v1028_v48, -inf }
 0x48b   : > { %v2415_v53 = vpop.f32.mrf.mxu0  ;;  %1033 = vmax.xlane.f32.xlu1 %v1032_v52  ;;  %v974_v54 = vpop.f32.mrf.mxu1 }
 0x48c   : > { %v1029_v55 = vmax.f32 %v974_v54, 0.0  ;;  %v1041_v58 = vsel %vm930_vm4, %v1031_v51, -inf }
 0x48d   : > { %v2409_v56 = vpop.f32.mrf.mxu1 }
 0x48e   : > { %v1035_v59 = vsel %vm930_vm4, %v1029_v55, -inf }
 0x48f   : > { %1042 = vmax.xlane.f32.xlu1 %v1041_v58  ;;  %1036 = vmax.xlane.f32.xlu0 %v1035_v59 }
 0x493   : > { %1039 = vmax.xlane.f32.xlu0 %v1038_v60 }
 0x4a0   : > { %1125 = vrot.lane.b32.xlu1 %v3199_v34, %s2882_s10 }
 0x4a4   : > { %1177 = vrot.lane.b32.xlu1 %v3203_v37, %s2883_s17 }
 0x514   : > { %v1034_v61 = vpop.xlane.xlu1 %1033 }
 0x515   : > { %v1044_v4 = vsub.f32 %v1028_v48, %v1034_v61 }
 0x517   : > { %v1048_v10 = vmul.f32 1.442695, %v1044_v4 }
 0x518   : > { %v1043_v62 = vpop.xlane.xlu1 %1042  ;;  %v1037_v63 = vpop.xlane.xlu0 %1036 }
 0x519   : > { %v1047_v1 = vsub.f32 %v1031_v51, %v1043_v62  ;;  %v1045_v3 = vsub.f32 %v1029_v55, %v1037_v63 }
 0x51b   : > { %v1054_v5 = vmul.f32 1.442695, %v1047_v1  ;;  %v1050_v6 = vmul.f32 1.442695, %v1045_v3 }
 0x51c   : > { %v1126_v7 = vpop.permute.xlu1 %1125  ;;  %v1040_v8 = vpop.xlane.xlu0 %1039 }
 0x51d   : > { %2620 = vpow2.f32 %v1054_v5  ;;  %v1046_v9 = vsub.f32 %v1030_v57, %v1040_v8  ;;  %2423 = vmatpush3.bf16.msra.mxu0 %v1126_v7 }
 0x51e   : > { %2434 = vmatprep.subr.bf16.mxu0 %v2879_v28  ;;  %2622 = vpow2.f32 %v1050_v6 }
 0x51f   : > { %v1052_v11 = vmul.f32 1.442695, %v1046_v9 }
 0x520   : > { %v1178_v20 = vpop.permute.xlu1 %1177 }
 0x521   : > { %2624 = vpow2.f32 %v1052_v11  ;;  %v1183_v45 = vsel %vm930_vm4, %v1178_v20, 0 }
 0x522   : > { %2626 = vpow2.f32 %v1048_v10 }
 0x52a   : > { %v2621_v12 = vpop.eup %2620 }
 0x52b   : > { %v1065_v13 = vsel %vm930_vm4, %v2621_v12, 0.0  ;;  %v2623_v14 = vpop.eup %2622 }
 0x52c   : > { %1066 = vadd.xlane.f32.xlu1 %v1065_v13  ;;  %v1059_v16 = vsel %vm930_vm4, %v2623_v14, 0.0 }
 0x52e   : > { %v2625_v15 = vpop.eup %2624 }
 0x52f   : > { %v1062_v17 = vsel %vm930_vm4, %v2625_v15, 0.0  ;;  %v2627_v18 = vpop.eup %2626 }
 0x530   : > { %1060 = vadd.xlane.f32.xlu1 %v1059_v16  ;;  %1063 = vadd.xlane.f32.xlu0 %v1062_v17  ;;  %v1056_v19 = vsel %vm930_vm4, %v2627_v18, 0.0 }
 0x534   : > { %1057 = vadd.xlane.f32.xlu0 %v1056_v19 }
 0x541   : > { %1229 = vrot.lane.b32.xlu1 %v3199_v34, %s2883_s17 }
 0x545   : > { %1227 = vrot.lane.b32.xlu1 %v3201_v36, %s2884_s25 }
 0x54a   : > { %1078 = vrot.lane.b32.xlu0 %v3203_v37, %s2882_s10 }
 0x54e   : > { %1175 = vrot.lane.b32.xlu0 %v3211_v44, %s2884_s25 }
 0x5b5   : > { %v1067_v24 = vpop.xlane.xlu1 %1066 }
 0x5b6   : > { %2628 = vrcp.f32 %v1067_v24 }
 0x5b9   : > { %v1061_v25 = vpop.xlane.xlu1 %1060  ;;  %v1064_v27 = vpop.xlane.xlu0 %1063 }
 0x5ba   : > { %2630 = vrcp.f32 %v1064_v27 }
 0x5bb   : > { %2632 = vrcp.f32 %v1061_v25 }
 0x5bd   : > { %v1058_v29 = vpop.xlane.xlu0 %1057  ;;  %v1230_v38 = vpop.permute.xlu1 %1229 }
 0x5be   : > { %2634 = vrcp.f32 %v1058_v29  ;;  %v1235_v43 = vsel %vm930_vm4, %v1230_v38, 0 }
 0x5c1   : > { %v1079_v30 = vpop.permute.xlu0 %1078  ;;  %v1228_v46 = vpop.permute.xlu1 %1227 }
 0x5c2   : > { %2417 = vmatpush3.bf16.msra.mxu1 %v1079_v30 }
 0x5c3   : > { %2428 = vmatprep.subr.bf16.mxu1 %v2879_v28  ;;  %v2629_v31 = vpop.eup %2628 }
 0x5c4   : > { %v1075_v36 = vmul.f32 %v2629_v31, %v2621_v12 }
 0x5c5   : > { %v1176_v47 = vpop.permute.xlu0 %1175 }
 0x5c7   : > { %v2631_v32 = vpop.eup %2630 }
 0x5c8   : > { %v2633_v33 = vpop.eup %2632  ;;  %v1074_v35 = vmul.f32 %v2631_v32, %v2625_v15 }
 0x5c9   : > { %v1073_v42 = vmul.f32 %v2633_v33, %v2623_v14 }
 0x5ca   : > { %v1077_v40 = vpack.c.bf16 %v1075_v36, %v1074_v35 }
 0x5cb   : > { %v2635_v39 = vpop.eup %2634 }
 0x5cc   : > { %v1072_v41 = vmul.f32 %v2635_v39, %v2627_v18  ;;  %2425 = vmatmul.mubr.msk.bf16.vlgmr.msra.gmra.mxu0 %vm930_vm4, %v1077_v40 }
 0x5cd   : > { %2435 = vmatpush3.bf16.xpose.msra.mxu0 %v1235_v43  ;;  %2436 = vmatprep.mubr.msk.bf16.mxu0 %vm2880_vm3, %v2879_v28 }
 0x5ce   : > { %v1076_v44 = vpack.c.bf16 %v1073_v42, %v1072_v41  ;;  %2446 = vmatprep.subr.bf16.mxu0 %v2879_v28 }
 0x5d0   : > { %2419 = vmatmul.mubr.msk.bf16.vlgmr.msra.gmra.mxu1 %vm930_vm4, %v1076_v44 }
 0x5d1   : > { %2429 = vmatpush3.bf16.xpose.msra.mxu1 %v1183_v45  ;;  %2430 = vmatprep.mubr.msk.bf16.mxu1 %vm2880_vm3, %v2879_v28 }
 0x5d2   : > { %2440 = vmatprep.subr.bf16.mxu1 %v2879_v28 }
 0x5d4   : > { %2437 = vmatmul.mubr.msk.bf16.vlgmr.msra.gmra.mxu0 %vm930_vm4, %v1228_v46 }
 0x5d5   : > { %2448 = vmatprep.mubr.msk.bf16.mxu0 %vm2880_vm3, %v2879_v28 }
 0x5d8   : > { %2431 = vmatmul.mubr.msk.bf16.vlgmr.msra.gmra.mxu1 %vm930_vm4, %v1176_v47 }
 0x5d9   : > { %2442 = vmatprep.mubr.msk.bf16.mxu1 %vm2880_vm3, %v2879_v28 }
 0x68c   : > { %v3257_v48 = vpop.f32.mrf.mxu0 }
 0x68e   : > { %v2426_v49 = vpop.f32.mrf.mxu0 }
 0x690   : > { %v3259_v50 = vpop.f32.mrf.mxu1  ;;  %v3261_v51 = vpop.f32.mrf.mxu0 }
 0x691   : > { %v1173_v52 = vpack.c.bf16 %v3261_v51, %v3257_v48 }
 0x692   : > { %v2420_v53 = vpop.f32.mrf.mxu1  ;;  %v2427_v54 = vpop.f32.mrf.mxu0 }
 0x694   : > { %v3265_v55 = vpop.f32.mrf.mxu1  ;;  %v1271_v57 = vpop.f32.mrf.mxu0 }
 0x695   : > { %v1172_v56 = vpack.c.bf16 %v3265_v55, %v3259_v50  ;;  %v1280_v63 = vmax.f32 %v1271_v57, 0.0  ;;  %v1465_v55 = vsub.s32 2, %v3182_v0 }
 0x696   : > { %v2421_v58 = vpop.f32.mrf.mxu1  ;;  %v2438_v28 = vpop.f32.mrf.mxu0 }
 0x697   : > { %v1288_v8 = vsel %vm930_vm4, %v1280_v63, -inf }
 0x698   : > { %v1219_v59 = vpop.f32.mrf.mxu1  ;;  %v1274_v61 = vpop.f32.mrf.mxu0 }
 0x699   : > { %v1278_v60 = vmax.f32 %v1219_v59, 0.0  ;;  %v1281_v7 = vmax.f32 %v1274_v61, 0.0  ;;  %v2602_v61 = vld [vmem:[%s3116_s20 + $0x8] sm:$0xff]  }
 0x69a   : > { %v2432_v62 = vpop.f32.mrf.mxu1  ;;  %v2439_v1 = vpop.f32.mrf.mxu0 }
 0x69b   : > { %v1282_v3 = vsel %vm930_vm4, %v1278_v60, -inf  ;;  %v1291_v10 = vsel %vm930_vm4, %v1281_v7, -inf  ;;  %v2603_v62 = vld [vmem:[%s3116_s20] sm:$0xff]  }
 0x69c   : > { %1283 = vmax.xlane.f32.xlu0 %v1282_v3  ;;  %v1222_v4 = vpop.f32.mrf.mxu1 }
 0x69d   : > { %v1279_v5 = vmax.f32 %v1222_v4, 0.0 }
 0x69e   : > { %v2433_v6 = vpop.f32.mrf.mxu1 }
 0x69f   : > { %v1285_v9 = vsel %vm930_vm4, %v1279_v5, -inf }
 0x6a0   : > { %1289 = vmax.xlane.f32.xlu0 %v1288_v8  ;;  %1286 = vmax.xlane.f32.xlu1 %v1285_v9 }
 0x6a4   : > { %1292 = vmax.xlane.f32.xlu0 %v1291_v10 }
 0x725   : > { %v1284_v11 = vpop.xlane.xlu0 %1283 }
 0x726   : > { %v1294_v12 = vsub.f32 %v1278_v60, %v1284_v11 }
 0x728   : > { %v1298_v16 = vmul.f32 1.442695, %v1294_v12 }
 0x729   : > { %v1290_v13 = vpop.xlane.xlu0 %1289  ;;  %v1287_v14 = vpop.xlane.xlu1 %1286 }
 0x72a   : > { %v1296_v15 = vsub.f32 %v1280_v63, %v1290_v13  ;;  %v1295_v18 = vsub.f32 %v1279_v5, %v1287_v14 }
 0x72c   : > { %v1302_v17 = vmul.f32 1.442695, %v1296_v15  ;;  %v1300_v24 = vmul.f32 1.442695, %v1295_v18 }
 0x72d   : > { %v1293_v19 = vpop.xlane.xlu0 %1292 }
 0x72e   : > { %2636 = vpow2.f32 %v1302_v17  ;;  %v1297_v20 = vsub.f32 %v1281_v7, %v1293_v19 }
 0x72f   : > { %2638 = vpow2.f32 %v1298_v16 }
 0x730   : > { %v1304_v25 = vmul.f32 1.442695, %v1297_v20 }
 0x732   : > { %2640 = vpow2.f32 %v1304_v25 }
 0x733   : > { %2642 = vpow2.f32 %v1300_v24 }
 0x73b   : > { %v2637_v27 = vpop.eup %2636 }
 0x73c   : > { %v1312_v29 = vsel %vm930_vm4, %v2637_v27, 0.0  ;;  %v2639_v30 = vpop.eup %2638 }
 0x73d   : > { %1313 = vadd.xlane.f32.xlu0 %v1312_v29  ;;  %v1306_v32 = vsel %vm930_vm4, %v2639_v30, 0.0 }
 0x73f   : > { %v2641_v31 = vpop.eup %2640 }
 0x740   : > { %v1315_v33 = vsel %vm930_vm4, %v2641_v31, 0.0  ;;  %v2643_v35 = vpop.eup %2642 }
 0x741   : > { %1307 = vadd.xlane.f32.xlu0 %v1306_v32  ;;  %1316 = vadd.xlane.f32.xlu1 %v1315_v33  ;;  %v1309_v36 = vsel %vm930_vm4, %v2643_v35, 0.0 }
 0x745   : > { %1310 = vadd.xlane.f32.xlu1 %v1309_v36 }
 0x756   : > { %1375 = vrot.lane.b32.xlu1 %v3199_v34, %s2885_s26 }
 0x757   : > { %1328 = vrot.lane.b32.xlu0 %v3203_v37, %s2885_s26 }
 0x7c6   : > { %v1314_v38 = vpop.xlane.xlu0 %1313 }
 0x7c7   : > { %2644 = vrcp.f32 %v1314_v38 }
 0x7ca   : > { %v1308_v39 = vpop.xlane.xlu0 %1307  ;;  %v1317_v40 = vpop.xlane.xlu1 %1316 }
 0x7cb   : > { %2646 = vrcp.f32 %v1317_v40 }
 0x7cc   : > { %2648 = vrcp.f32 %v1308_v39 }
 0x7ce   : > { %v1329_v41 = vpop.permute.xlu0 %1328  ;;  %v1311_v42 = vpop.xlane.xlu1 %1310 }
 0x7cf   : > { %2650 = vrcp.f32 %v1311_v42  ;;  %2441 = vmatpush3.bf16.msra.mxu1 %v1329_v41 }
 0x7d0   : > { %2452 = vmatprep.subr.bf16.mxu1 %v2602_v61 }
 0x7d2   : > { %v1376_v43 = vpop.permute.xlu1 %1375 }
 0x7d3   : > { %2447 = vmatpush3.bf16.msra.mxu0 %v1376_v43 }
 0x7d4   : > { %v2645_v44 = vpop.eup %2644 }
 0x7d5   : > { %v1324_v34 = vmul.f32 %v2645_v44, %v2637_v27 }
 0x7d8   : > { %v2647_v45 = vpop.eup %2646 }
 0x7d9   : > { %v2649_v46 = vpop.eup %2648  ;;  %v1325_v47 = vmul.f32 %v2647_v45, %v2641_v31 }
 0x7da   : > { %v1322_v53 = vmul.f32 %v2649_v46, %v2639_v30 }
 0x7db   : > { %v1327_v49 = vpack.c.bf16 %v1325_v47, %v1324_v34 }
 0x7dc   : > { %v2651_v37 = vpop.eup %2650 }
 0x7dd   : > { %v1323_v54 = vmul.f32 %v2651_v37, %v2643_v35  ;;  %2449 = vmatmul.mubr.msk.bf16.vlgmr.msra.gmra.mxu0 %vm930_vm4, %v1327_v49 }
 0x7df   : > { %v1326_v57 = vpack.c.bf16 %v1323_v54, %v1322_v53  ;;  %v2606_v54 = vld [vmem:[%s3121_s8 + $0x8] sm:$0xff]  }
 0x7e0   : > { %2460 = vmatprep.subr.bf16.mxu0 %v2606_v54 }
 0x7e1   : > { %2443 = vmatmul.mubr.msk.bf16.vlgmr.msra.gmra.mxu1 %vm930_vm4, %v1326_v57  ;;  %v2607_v57 = vld [vmem:[%s3121_s8] sm:$0xff]   ;;  %2461 = vmatpush3.bf16.msra.mxu0 %v2606_v54 }
 0x7e2   : > { %2453 = vmatpush3.bf16.msra.mxu1 %v2602_v61  ;;  %2462 = vmatprep.subr.bf16.mxu0 %v2607_v57 }
 0x7e3   : > { %2454 = vmatprep.subr.bf16.mxu1 %v2603_v62 }
 0x7e5   : > { %2463 = vmatpush3.bf16.msra.mxu0 %v2607_v57 }
 0x7e6   : > { %2455 = vmatpush3.bf16.msra.mxu1 %v2603_v62 }
 0x89d   : > { %v1415_v58 = vpop.f32.mrf.mxu0 }
 0x89f   : > { %v2450_v28 = vpop.f32.mrf.mxu0 }
 0x8a1   : > { %v1368_v59 = vpop.f32.mrf.mxu1  ;;  %v1418_v60 = vpop.f32.mrf.mxu0 }
 0x8a2   : > { %v1423_v6 = vpack.c.bf16 %v1418_v60, %v1415_v58 }
 0x8a3   : > { %v2444_v63 = vpop.f32.mrf.mxu1  ;;  %v2451_v1 = vpop.f32.mrf.mxu0 }
 0x8a5   : > { %v1371_v3 = vpop.f32.mrf.mxu1 }
 0x8a6   : > { %v1422_v4 = vpack.c.bf16 %v1371_v3, %v1368_v59 }
 0x8a7   : > { %v2445_v5 = vpop.f32.mrf.mxu1 }
 0x8a8   : > { %1426 = vrot.lane.b32.xlu1 %v1422_v4, %s2886_s27 }
 0x8ac   : > { %1428 = vrot.lane.b32.xlu1 %v1423_v6, %s2886_s27 }
 0x91a   : > { %v1427_v7 = vpop.permute.xlu1 %1426 }
 0x91b   : > { %v1432_v8 = vsel %vm930_vm4, %v1172_v56, %v1427_v7  ;;  %v1466_v56 = vrot.slane %v3186_v2, %v1465_v55  ;;  %v1602_v7 = vsub.s32 3, %v3182_v0 }
 0x91c   : > { %v2303_v9 = vcombine.low %v1432_v8, %v1432_v8  ;;  %v2304_v10 = vcombine.high %v1432_v8, %v1432_v8 }
 0x91e   : > { %1451 = vst.msk [vmem:[#allocation3] sm:$0xf] %vm1450_vm5, %v2303_v9  ;;  %1452 = vst.msk [vmem:[#allocation3 + $0x4] sm:$0xf] %vm1450_vm5, %v2304_v10  ;;  %v1429_v11 = vpop.permute.xlu1 %1428  ;;  %v1603_v10 = vrot.slane %v3186_v2, %v1602_v7 }
 0x91f   : > { %v1435_v12 = vsel %vm930_vm4, %v1173_v52, %v1429_v11  ;;  %v1610_v11 = vsub.s32 4, %v3182_v0 }
 0x920   : > { %v2305_v13 = vcombine.low %v1435_v12, %v1435_v12  ;;  %v2306_v14 = vcombine.high %v1435_v12, %v1435_v12 }
 0x922   : > { %1453 = vst.msk [vmem:[#allocation3 + $0x8] sm:$0xf] %vm1450_vm5, %v2305_v13  ;;  %1454 = vst.msk [vmem:[#allocation3 + $0xc] sm:$0xf] %vm1450_vm5, %v2306_v14 }
 0x925   : > { %v2604_v15 = vld [vmem:[#allocation3] sm:$0xff]  }
 0x926   : > { %2456 = vmatprep.mubr.msk.bf16.mxu1 %vm776_vm2, %v2604_v15 }
 0x929   : > { %v2605_v50 = vld [vmem:[#allocation3 + $0x8] sm:$0xff]  }
 0x92a   : > { %2457 = vmatmul.mubr.msk.bf16.vlgmr.msra.gmra.mxu1 %vm776_vm2, %v2605_v50  ;;  %v1611_v50 = vrot.slane %v3186_v2, %v1610_v11  ;;  %v2608_v2 = vld [vmem:[%s3126_s13 + $0x18] sm:$0xff]  }
 0x92b   : > { %2468 = vmatprep.subr.bf16.mxu1 %v2608_v2 }
 0x92c   : > { %2469 = vmatpush3.bf16.msra.mxu1 %v2608_v2 }
 0x9ea   : > { %v2458_v16 = vpop.f32.mrf.mxu1 }
 0x9eb   : > { %v1538_v18 = vadd.f32 %v2458_v16, %v1466_v56 }
 0x9ec   : > { %v1529_v17 = vpop.f32.mrf.mxu1 }
 0x9ed   : > { %v1530_v48 = vadd.f32 %v1529_v17, %v1466_v56  ;;  %v3301_v20 = vadd.f32 %v1538_v18, %v3158_v22 }
 0x9ee   : > { %v2459_v51 = vpop.f32.mrf.mxu1 }
 0x9ef   : > { %v3298_v52 = vadd.f32 %v1530_v48, %v3156_v21  ;;  %v1541_v24 = vadd.f32 %v2459_v51, %v1466_v56  ;;  %v1554_v31 = vsel %vm776_vm2, %v3301_v20, 0.0 }
 0x9f0   : > { %v1532_v19 = vpop.f32.mrf.mxu1 }
 0x9f1   : > { %v1533_v25 = vadd.f32 %v1532_v19, %v1466_v56  ;;  %v1548_v27 = vsel %vm776_vm2, %v3298_v52, 0.0  ;;  %v3309_v30 = vadd.f32 %v1541_v24, %v3166_v26 }
 0x9f2   : > { %1549 = vadd.xlane.f32.xlu0 %v1548_v27 }
 0x9f3   : > { %v3306_v29 = vadd.f32 %v1533_v25, %v3160_v23  ;;  %v1557_v22 = vsel %vm776_vm2, %v3309_v30, 0.0 }
 0x9f5   : > { %v1551_v21 = vsel %vm776_vm2, %v3306_v29, 0.0 }
 0x9f6   : > { %1552 = vadd.xlane.f32.xlu1 %v1551_v21  ;;  %1555 = vadd.xlane.f32.xlu0 %v1554_v31  ;;  %v2609_v31 = vld [vmem:[%s3126_s13 + $0x10] sm:$0xff]  }
 0x9f7   : > { %2470 = vmatprep.subr.bf16.mxu1 %v2609_v31 }
 0x9f8   : > { %2471 = vmatpush3.bf16.msra.mxu1 %v2609_v31 }
 0x9fa   : > { %1558 = vadd.xlane.f32.xlu0 %v1557_v22  ;;  %v2610_v22 = vld [vmem:[%s3126_s13 + $0x8] sm:$0xff]  }
 0x9fb   : > { %2472 = vmatprep.subr.bf16.mxu1 %v2610_v22 }
 0x9fc   : > { %2473 = vmatpush3.bf16.msra.mxu1 %v2610_v22 }
 0xa7b   : > { %v1550_v32 = vpop.xlane.xlu0 %1549 }
 0xa7c   : > { %v1560_v33 = vmul.f32 0.03125, %v1550_v32  ;;  %v2611_v32 = vld [vmem:[%s3126_s13] sm:$0xff]  }
 0xa7d   : > { %2474 = vmatprep.subr.bf16.mxu1 %v2611_v32 }
 0xa7e   : > { %v1564_v23 = vsub.f32 %v3298_v52, %v1560_v33  ;;  %2475 = vmatpush3.bf16.msra.mxu1 %v2611_v32  ;;  %v2313_v33 = vld [vmem:[%s3087_s12] ss:$0 sm:$0xff]  ;;  %s3475_s12 = sld [smem:[#allocation23_spill]] (!%p2324_p11) }
 0xa7f   : > { %v1553_v35 = vpop.xlane.xlu1 %1552  ;;  %v1556_v36 = vpop.xlane.xlu0 %1555 }
 0xa80   : > { %v1561_v26 = vmul.f32 0.03125, %v1553_v35  ;;  %v1562_v38 = vmul.f32 0.03125, %v1556_v36  ;;  %v1568_v39 = vmul.f32 %v1564_v23, %v1564_v23 }
 0xa82   : > { %v1565_v40 = vsub.f32 %v3306_v29, %v1561_v26  ;;  %v1566_v41 = vsub.f32 %v3301_v20, %v1562_v38  ;;  %v1572_v42 = vsel %vm776_vm2, %v1568_v39, 0.0 }
 0xa83   : > { %1573 = vadd.xlane.f32.xlu0 %v1572_v42  ;;  %v1559_v43 = vpop.xlane.xlu0 %1558 }
 0xa84   : > { %v1563_v44 = vmul.f32 0.03125, %v1559_v43  ;;  %v1569_v45 = vmul.f32 %v1565_v40, %v1565_v40  ;;  %v1570_v46 = vmul.f32 %v1566_v41, %v1566_v41 }
 0xa86   : > { %v1567_v34 = vsub.f32 %v3309_v30, %v1563_v44  ;;  %v1575_v47 = vsel %vm776_vm2, %v1569_v45, 0.0  ;;  %v1578_v37 = vsel %vm776_vm2, %v1570_v46, 0.0 }
 0xa87   : > { %1576 = vadd.xlane.f32.xlu1 %v1575_v47  ;;  %1579 = vadd.xlane.f32.xlu0 %v1578_v37 }
 0xa88   : > { %v1571_v49 = vmul.f32 %v1567_v34, %v1567_v34 }
 0xa8a   : > { %v1581_v53 = vsel %vm776_vm2, %v1571_v49, 0.0 }
 0xa8b   : > { %1582 = vadd.xlane.f32.xlu1 %v1581_v53 }
 0xb0c   : > { %v1574_v58 = vpop.xlane.xlu0 %1573 }
 0xb0d   : > { %v1584_v28 = vmul.f32 0.03125, %v1574_v58 }
 0xb0f   : > { %v1588_v59 = vadd.f32 1e-05, %v1584_v28 }
 0xb10   : > { %v1577_v60 = vpop.xlane.xlu1 %1576  ;;  %v1580_v61 = vpop.xlane.xlu0 %1579 }
 0xb11   : > { %2652 = vrsqrt.f32 %v1588_v59  ;;  %v1585_v62 = vmul.f32 0.03125, %v1577_v60  ;;  %v1586_v63 = vmul.f32 0.03125, %v1580_v61 }
 0xb13   : > { %v1589_v1 = vadd.f32 1e-05, %v1585_v62  ;;  %v1590_v3 = vadd.f32 1e-05, %v1586_v63 }
 0xb14   : > { %v1583_v4 = vpop.xlane.xlu1 %1582 }
 0xb15   : > { %2654 = vrsqrt.f32 %v1589_v1  ;;  %v1587_v5 = vmul.f32 0.03125, %v1583_v4 }
 0xb16   : > { %2656 = vrsqrt.f32 %v1590_v3 }
 0xb17   : > { %v1591_v6 = vadd.f32 1e-05, %v1587_v5 }
 0xb19   : > { %2658 = vrsqrt.f32 %v1591_v6 }
 0xb1e   : > { %v2653_v8 = vpop.eup %2652 }
 0xb1f   : > { %v1596_v9 = vmul.f32 %v2653_v8, %v1564_v23 }
 0xb21   : > { %v1604_v15 = vmul.f32 %v1603_v10, %v1596_v9 }
 0xb22   : > { %v2655_v12 = vpop.eup %2654 }
 0xb23   : > { %v2657_v13 = vpop.eup %2656  ;;  %v1597_v14 = vmul.f32 %v2655_v12, %v1565_v40  ;;  %v1612_v18 = vadd.f32 %v1611_v50, %v1604_v15 }
 0xb24   : > { %v1598_v55 = vmul.f32 %v2657_v13, %v1566_v41 }
 0xb25   : > { %v1605_v56 = vmul.f32 %v1603_v10, %v1597_v14 }
 0xb26   : > { %v2659_v16 = vpop.eup %2658  ;;  %v1606_v51 = vmul.f32 %v1603_v10, %v1598_v55 }
 0xb27   : > { %v1599_v17 = vmul.f32 %v2659_v16, %v1567_v34  ;;  %v1613_v48 = vadd.f32 %v1611_v50, %v1605_v56 }
 0xb28   : > { %v1614_v25 = vadd.f32 %v1611_v50, %v1606_v51 }
 0xb29   : > { %v1616_v19 = vpack.c.bf16 %v1613_v48, %v1612_v18  ;;  %v1607_v24 = vmul.f32 %v1603_v10, %v1599_v17 }
 0xb2b   : > { %2464 = vmatprep.mubr.msk.bf16.mxu0 %vm776_vm2, %v1616_v19  ;;  %v1615_v27 = vadd.f32 %v1611_v50, %v1607_v24 }
 0xb2d   : > { %v1617_v21 = vpack.c.bf16 %v1615_v27, %v1614_v25 }
 0xb2f   : > { %2465 = vmatmul.mubr.msk.bf16.vlgmr.msra.gmra.mxu0 %vm776_vm2, %v1617_v21 }
 0xbef   : > { %v2466_v23 = vpop.f32.mrf.mxu0 }
 0xbf0   : > { %v3338_v35 = vadd.f32 %v2466_v23, %v2313_v33 }
 0xbf1   : > { %v1681_v36 = vpop.f32.mrf.mxu0 }
 0xbf2   : > { %v3341_v26 = vmul.f32 0.70710677, %v3338_v35  ;;  %v3343_v38 = vadd.f32 %v2313_v33, %v1681_v36 }
 0xbf3   : > { %v2467_v39 = vpop.f32.mrf.mxu0 }
 0xbf4   : > { %v1714_v40 = vand.u32 2147483647, %v3341_v26  ;;  %v3347_v41 = vmul.f32 0.70710677, %v3343_v38  ;;  %v3349_v42 = vadd.f32 %v2467_v39, %v2313_v33  ;;  %vm1706_vm6 = vcmp.ge.f32.partialorder %v3341_v26, 0.0 }
 0xbf5   : > { %v1684_v43 = vpop.f32.mrf.mxu0 }
 0xbf6   : > { %v1718_v44 = vmul.f32 0.3275911, %v1714_v40  ;;  %v1712_v45 = vand.u32 2147483647, %v3347_v41  ;;  %v3353_v46 = vmul.f32 0.70710677, %v3349_v42  ;;  %v3355_v34 = vadd.f32 %v2313_v33, %v1684_v43 }
 0xbf7   : > { %v1770_v61 = vsub.f32 0.0, %v1714_v40  ;;  %vm1704_vm7 = vcmp.ge.f32.partialorder %v3347_v41, 0.0 }
 0xbf8   : > { %v1722_v47 = vadd.f32 1.0, %v1718_v44  ;;  %v1716_v37 = vmul.f32 0.3275911, %v1712_v45  ;;  %v1715_v49 = vand.u32 2147483647, %v3353_v46  ;;  %v1768_v62 = vsub.f32 0.0, %v1712_v45 }
 0xbf9   : > { %v3359_v53 = vmul.f32 0.70710677, %v3355_v34  ;;  %v1774_v63 = vmul.f32 %v1770_v61, %v1714_v40  ;;  %vm1707_vm8 = vcmp.ge.f32.partialorder %v3353_v46, 0.0 }
 0xbfa   : > { %2660 = vrcp.f32 %v1722_v47  ;;  %v1720_v54 = vadd.f32 1.0, %v1716_v37  ;;  %v1719_v57 = vmul.f32 0.3275911, %v1715_v49  ;;  %v1771_v1 = vsub.f32 0.0, %v1715_v49 }
 0xbfb   : > { %v1713_v58 = vand.u32 2147483647, %v3359_v53  ;;  %v1772_v4 = vmul.f32 %v1768_v62, %v1712_v45  ;;  %v1780_v7 = vmul.f32 1.442695, %v1774_v63  ;;  %vm1705_vm9 = vcmp.ge.f32.partialorder %v3359_v53, 0.0 }
 0xbfc   : > { %2662 = vrcp.f32 %v1720_v54  ;;  %v1723_v28 = vadd.f32 1.0, %v1719_v57  ;;  %v1775_v8 = vmul.f32 %v1771_v1, %v1715_v49 }
 0xbfd   : > { %v1717_v59 = vmul.f32 0.3275911, %v1713_v58  ;;  %v1769_v6 = vsub.f32 0.0, %v1713_v58  ;;  %v1776_v12 = vmul.f32 1.442695, %v1772_v4 }
 0xbfe   : > { %2664 = vrcp.f32 %v1723_v28  ;;  %v1782_v56 = vmul.f32 1.442695, %v1775_v8 }
 0xbff   : > { %v1721_v60 = vadd.f32 1.0, %v1717_v59  ;;  %v1773_v15 = vmul.f32 %v1769_v6, %v1713_v58 }
 0xc01   : > { %2666 = vrcp.f32 %v1721_v60  ;;  %v1778_v24 = vmul.f32 1.442695, %v1773_v15 }
 0xc02   : > { %2668 = vpow2.f32 %v1780_v7 }
 0xc03   : > { %2670 = vpow2.f32 %v1776_v12 }
 0xc04   : > { %2672 = vpow2.f32 %v1782_v56 }
 0xc05   : > { %2674 = vpow2.f32 %v1778_v24  ;;  %v1698_v24 = vmul.f32 0.5, %v3338_v35 }
 0xc07   : > { %v2661_v3 = vpop.eup %2660 }
 0xc08   : > { %v1734_v5 = vmul.f32 1.0614054, %v2661_v3 }
 0xc09   : > { %v2663_v9 = vpop.eup %2662 }
 0xc0a   : > { %v1738_v10 = vadd.f32 -1.4531521, %v1734_v5  ;;  %v1732_v11 = vmul.f32 1.0614054, %v2663_v9 }
 0xc0b   : > { %v2665_v13 = vpop.eup %2664 }
 0xc0c   : > { %v1742_v14 = vmul.f32 %v2661_v3, %v1738_v10  ;;  %v1736_v50 = vadd.f32 -1.4531521, %v1732_v11  ;;  %v1735_v55 = vmul.f32 1.0614054, %v2665_v13  ;;  %v2887_v10 = vmov -1.0  }
 0xc0d   : > { %v1708_v11 = vsel %vm1704_vm7, 1.0, %v2887_v10  ;;  %v1711_v15 = vsel %vm1707_vm8, 1.0, %v2887_v10  ;;  %v1709_v56 = vsel %vm1705_vm9, 1.0, %v2887_v10 }
 0xc0e   : > { %v1746_v16 = vadd.f32 1.4214138, %v1742_v14  ;;  %v2667_v17 = vpop.eup %2666  ;;  %v1740_v18 = vmul.f32 %v2663_v9, %v1736_v50  ;;  %v1739_v48 = vadd.f32 -1.4531521, %v1735_v55 }
 0xc0f   : > { %v1733_v19 = vmul.f32 1.0614054, %v2667_v17  ;;  %v2669_v54 = vpop.eup %2668 }
 0xc10   : > { %v1750_v51 = vmul.f32 %v2661_v3, %v1746_v16  ;;  %v1744_v25 = vadd.f32 1.4214138, %v1740_v18  ;;  %v1743_v27 = vmul.f32 %v2665_v13, %v1739_v48  ;;  %v2671_v60 = vpop.eup %2670  ;;  %v1696_v48 = vmul.f32 0.5, %v3343_v38 }
 0xc11   : > { %v1737_v2 = vadd.f32 -1.4531521, %v1733_v19  ;;  %v2673_v1 = vpop.eup %2672 }
 0xc12   : > { %v1754_v21 = vadd.f32 -0.28449672, %v1750_v51  ;;  %v1748_v31 = vmul.f32 %v2663_v9, %v1744_v25  ;;  %v1747_v22 = vadd.f32 1.4214138, %v1743_v27  ;;  %v2675_v8 = vpop.eup %2674  ;;  %v1697_v51 = vmul.f32 0.5, %v3355_v34 }
 0xc13   : > { %v1741_v33 = vmul.f32 %v2667_v17, %v1737_v2 }
 0xc14   : > { %v1758_v32 = vmul.f32 %v2661_v3, %v1754_v21  ;;  %v1752_v23 = vadd.f32 -0.28449672, %v1748_v31  ;;  %v1751_v36 = vmul.f32 %v2665_v13, %v1747_v22  ;;  %v1816_v22 = vsub.s32 5, %v3182_v0 }
 0xc15   : > { %v1745_v40 = vadd.f32 1.4214138, %v1741_v33 }
 0xc16   : > { %v1762_v39 = vadd.f32 0.2548296, %v1758_v32  ;;  %v1756_v43 = vmul.f32 %v2663_v9, %v1752_v23  ;;  %v1755_v44 = vadd.f32 -0.28449672, %v1751_v36  ;;  %v2676_v32 = vld [vmem:[%s3106_s14] sm:$0x3f] }
 0xc17   : > { %v1749_v47 = vmul.f32 %v2667_v17, %v1745_v40 }
 0xc18   : > { %v1766_v45 = vmul.f32 %v2661_v3, %v1762_v39  ;;  %v1760_v37 = vadd.f32 0.2548296, %v1756_v43  ;;  %v1759_v49 = vmul.f32 %v2665_v13, %v1755_v44 }
 0xc19   : > { %v1753_v57 = vadd.f32 -0.28449672, %v1749_v47 }
 0xc1a   : > { %v1786_v58 = vmul.f32 %v2669_v54, %v1766_v45  ;;  %v1764_v28 = vmul.f32 %v2663_v9, %v1760_v37  ;;  %v1763_v59 = vadd.f32 0.2548296, %v1759_v49  ;;  %v1710_v9 = vsel %vm1706_vm6, 1.0, %v2887_v10 }
 0xc1b   : > { %v1757_v61 = vmul.f32 %v2667_v17, %v1753_v57 }
 0xc1c   : > { %v1784_v62 = vmul.f32 %v2671_v60, %v1764_v28  ;;  %v1767_v63 = vmul.f32 %v2665_v13, %v1763_v59  ;;  %v1790_v5 = vsub.f32 1.0, %v1786_v58 }
 0xc1d   : > { %v1761_v4 = vadd.f32 0.2548296, %v1757_v61 }
 0xc1e   : > { %v1788_v3 = vsub.f32 1.0, %v1784_v62  ;;  %v1787_v6 = vmul.f32 %v2673_v1, %v1767_v63  ;;  %v1794_v26 = vmul.f32 %v1790_v5, %v1710_v9 }
 0xc1f   : > { %v1765_v7 = vmul.f32 %v2667_v17, %v1761_v4  ;;  %v1699_v17 = vmul.f32 0.5, %v3349_v42  ;;  %v1817_v42 = vrot.slane %v2676_v32, %v1816_v22 }
 0xc20   : > { %v1791_v12 = vsub.f32 1.0, %v1787_v6  ;;  %v1792_v14 = vmul.f32 %v1788_v3, %v1708_v11  ;;  %v1798_v46 = vadd.f32 1.0, %v1794_v26 }
 0xc21   : > { %v1785_v13 = vmul.f32 %v2675_v8, %v1765_v7 }
 0xc22   : > { %v1795_v50 = vmul.f32 %v1791_v12, %v1711_v15  ;;  %v1796_v16 = vadd.f32 1.0, %v1792_v14  ;;  %v1802_v21 = vmul.f32 %v1798_v46, %v1698_v24 }
 0xc23   : > { %v1789_v41 = vsub.f32 1.0, %v1785_v13 }
 0xc24   : > { %v1799_v55 = vadd.f32 1.0, %v1795_v50  ;;  %v1800_v25 = vmul.f32 %v1796_v16, %v1696_v48 }
 0xc25   : > { %v1793_v18 = vmul.f32 %v1789_v41, %v1709_v56 }
 0xc26   : > { %v1803_v53 = vmul.f32 %v1799_v55, %v1699_v17 }
 0xc27   : > { %v1797_v19 = vadd.f32 1.0, %v1793_v18 }
 0xc28   : > { %v1805_v31 = vpack.c.bf16 %v1803_v53, %v1802_v21 }
 0xc29   : > { %v1801_v27 = vmul.f32 %v1797_v19, %v1697_v51 }
 0xc2b   : > { %v1804_v2 = vpack.c.bf16 %v1801_v27, %v1800_v25 }
 0xc2d   : > { %2476 = vmatprep.mubr.msk.bf16.mxu1 %vm1842_vm10, %v1804_v2 }
 0xc2e   : > { %2477 = vmatmul.mubr.msk.bf16.vlgmr.msra.gmra.mxu1 %vm1842_vm10, %v1805_v31 }
 0xcee   : > { %v2478_v33 = vpop.f32.mrf.mxu1 }
 0xcef   : > { %v1892_v38 = vadd.f32 %v2478_v33, %v1817_v42 }
 0xcf0   : > { %v1883_v23 = vpop.f32.mrf.mxu1 }
 0xcf1   : > { %v1900_v34 = vadd.f32 %v1892_v38, %v3301_v20  ;;  %v1884_v36 = vadd.f32 %v1883_v23, %v1817_v42 }
 0xcf2   : > { %v2479_v35 = vpop.f32.mrf.mxu1 }
 0xcf3   : > { %1904 = vst.msk [vmem:[#allocation2 + $0x10] sm:$0xff] %vm776_vm2, %v1900_v34  ;;  %v1898_v39 = vadd.f32 %v1884_v36, %v3298_v52  ;;  %v1895_v40 = vadd.f32 %v2479_v35, %v1817_v42 }
 0xcf4   : > { %v1886_v43 = vpop.f32.mrf.mxu1 }
 0xcf5   : > { %1902 = vst.msk [vmem:[#allocation2] sm:$0xff] %vm776_vm2, %v1898_v39  ;;  %v1901_v44 = vadd.f32 %v1895_v40, %v3309_v30  ;;  %v1887_v45 = vadd.f32 %v1886_v43, %v1817_v42  ;;  %1909 = sbr.rel (%p2324_p11) target bundleno = 3864 (0xf18), region = 100 }
 0xcf7   : > { %1905 = vst.msk [vmem:[#allocation2 + $0x18] sm:$0xff] %vm776_vm2, %v1901_v44  ;;  %v1899_v47 = vadd.f32 %v1887_v45, %v3306_v29 }
 0xcf9   : > { %1903 = vst.msk [vmem:[#allocation2 + $0x8] sm:$0xff] %vm776_vm2, %v1899_v47 }
 0xcfa   : > { %v1910_v20 = vsel %vm776_vm2, %v1898_v39, 0.0  ;;  %v1911_v52 = vsel %vm776_vm2, %v1899_v47, 0.0  ;;  %v1919_v37 = vsel %vm776_vm2, %v1900_v34, 0.0  ;;  %v1920_v49 = vsel %vm776_vm2, %v1901_v44, 0.0  ;;  %v2677_v55 = vld [vmem:[%s3475_s12 + $0x8] sm:$0xff]   ;;  %v2678_v16 = vld [vmem:[%s3475_s12] sm:$0xff]  }
 0xcfb   : > { %v1912_v54 = vadd.f32 %v1911_v52, %v1910_v20  ;;  %v1921_v30 = vadd.f32 %v1920_v49, %v1919_v37  ;;  %vm1935_vm11 = vcmask 1041409   ;;  %vm1938_vm12 = vcmask 254976   ;;  %v2325_v51 = vld [vmem:[#allocation7] ss:$0 sm:$0xff]  ;;  %v2326_v53 = vld [vmem:[#allocation9] ss:$0 sm:$0xff] }
 0xcfc   : > { %v2888_v56 = vmov 0.0   ;;  %vm2889_vm13 = vmmov 0   ;;  %v2890_v36 = vmov 1966171168   ;;  %v2327_v40 = vld [vmem:[#allocation10] ss:$0 sm:$0xff] }
 0xcfd   : > { %v1913_v57 = vrot.slane %v1912_v54, 4  ;;  %v1922_v58 = vrot.slane %v1921_v30, 4  ;;  %2480 = vmatprep.subr.bf16.mxu0 %v2888_v56  ;;  %2484 = vmatprep.mubr.msk.bf16.mxu0 %vm2889_vm13, %v2888_v56  ;;  %v2061_v35 = vunpack.c.l.s4 %v2890_v36 }
 0xcfe   : > { %2481 = vmatpush3.bf16.msra.mxu0 %v2677_v55 }
 0xcff   : > { %v1914_v28 = vadd.f32 %v1913_v57, %v1912_v54  ;;  %v1923_v59 = vadd.f32 %v1922_v58, %v1921_v30  ;;  %2482 = vmatprep.subr.bf16.mxu0 %v2888_v56  ;;  %v2062_v39 = vunpack.c.0.s8 %v2061_v35 }
 0xd01   : > { %v1915_v29 = vrot.slane %v1914_v28, 2  ;;  %v1924_v60 = vrot.slane %v1923_v59, 2  ;;  %v2065_v43 = vsub.s32 %v2062_v39, %v3182_v0 }
 0xd02   : > { %2483 = vmatpush3.bf16.msra.mxu0 %v2678_v16 }
 0xd03   : > { %v1916_v61 = vadd.f32 %v1915_v29, %v1914_v28  ;;  %v1925_v62 = vadd.f32 %v1924_v60, %v1923_v59 }
 0xd05   : > { %v1917_v63 = vrot.slane %v1916_v61, 1  ;;  %v1926_v1 = vrot.slane %v1925_v62, 1 }
 0xd07   : > { %v1918_v4 = vadd.f32 %v1917_v63, %v1916_v61  ;;  %v1927_v5 = vadd.f32 %v1926_v1, %v1925_v62 }
 0xd09   : > { %v1929_v3 = vmul.f32 0.0625, %v1918_v4  ;;  %v1930_v6 = vmul.f32 0.0625, %v1927_v5 }
 0xd0b   : > { %v1936_v7 = vsel %vm1935_vm11, %v1930_v6, %v1929_v3 }
 0xd0c   : > { %v1939_v8 = vsel %vm1938_vm12, %v1936_v7, 0.0 }
 0xd0d   : > { %1940 = vadd.xlane.f32.xlu0 %v1939_v8 }
 0xd96   : > { %v1941_v10 = vpop.xlane.xlu0 %1940 }
 0xd97   : > { %v1942_v9 = vmul.f32 0.03125, %v1941_v10 }
 0xd99   : > { %v1944_v11 = vrot.slane %v1942_v9, 1  ;;  %v1947_v12 = vsub.f32 %v1929_v3, %v1942_v9 }
 0xd9b   : > { %v1948_v14 = vsub.f32 %v1930_v6, %v1944_v11  ;;  %v1949_v13 = vmul.f32 %v1947_v12, %v1947_v12 }
 0xd9d   : > { %v1950_v15 = vmul.f32 %v1948_v14, %v1948_v14 }
 0xd9f   : > { %v1953_v26 = vrot.slane %v1950_v15, 7 }
 0xda1   : > { %v1954_v50 = vsel %vm1935_vm11, %v1953_v26, %v1949_v13 }
 0xda2   : > { %v1956_v41 = vsel %vm1938_vm12, %v1954_v50, 0.0 }
 0xda3   : > { %1957 = vadd.xlane.f32.xlu0 %v1956_v41 }
 0xe2c   : > { %v1958_v18 = vpop.xlane.xlu0 %1957 }
 0xe2d   : > { %v1959_v46 = vmul.f32 0.03125, %v1958_v18 }
 0xe2f   : > { %v1960_v17 = vadd.f32 1e-05, %v1959_v46 }
 0xe31   : > { %2679 = vrsqrt.f32 %v1960_v17 }
 0xe3e   : > { %v2680_v48 = vpop.eup %2679 }
 0xe3f   : > { %v1963_v19 = vrot.slane %v2680_v48, 1  ;;  %v1966_v24 = vmul.f32 %v2680_v48, %v1947_v12 }
 0xe41   : > { %v1967_v25 = vmul.f32 %v1963_v19, %v1948_v14  ;;  %v1974_v27 = vmul.f32 %v2325_v51, %v1966_v24 }
 0xe43   : > { %v1975_v21 = vmul.f32 %v2325_v51, %v1967_v25  ;;  %v1982_v2 = vadd.f32 %v2326_v53, %v1974_v27 }
 0xe45   : > { %v1983_v31 = vadd.f32 %v2326_v53, %v1975_v21  ;;  %v1984_v22 = vpack.c.bf16 %v1982_v2, %v1982_v2 }
 0xe47   : > { %v1985_v32 = vpack.c.bf16 %v1983_v31, %v1983_v31  ;;  %v1999_v33 = vunpack.c.l.b16 %v1984_v22 }
 0xe49   : > { %v2000_v42 = vunpack.c.l.b16 %v1985_v32 }
 0xe4b   : > { %v2001_v38 = vrot.slane %v2000_v42, 7 }
 0xe4d   : > { %v2002_v23 = vsel %vm1935_vm11, %v2001_v38, %v1999_v33 }
 0xe4e   : > { %v2003_v34 = vpack.c.b16 %v2002_v23, %v2002_v23 }
 0xe50   : > { %2485 = vmatmul.mubr.msk.bf16.vlgmr.msra.gmra.mxu0 %vm776_vm2, %v2003_v34 }
 0xf10   : > { %v2053_v44 = vpop.f32.mrf.mxu0 }
 0xf11   : > { %v2054_v45 = vadd.f32 %v2327_v40, %v2053_v44 }
 0xf12   : > { %v2486_v47 = vpop.f32.mrf.mxu0 }
 0xf13   : > { %v2066_v20 = vrot.slane %v2054_v45, %v2065_v43 }
 0xf14   : > { %v2056_v52 = vpop.f32.mrf.mxu0 }
 0xf15   : > { %v2067_v37 = vcombine.high %v2066_v20, %v2066_v20  ;;  %2331 = vst.sshfl [vmem:[#allocation12] sm:$0x1 pattern:$0x73625140] %v2066_v20 }
 0xf16   : > { %v2487_v49 = vpop.f32.mrf.mxu0 }
 0xf17   : > { %2332 = vst.sshfl [vmem:[#allocation12 + $0x1] sm:$0x1 pattern:$0x73625140] %v2067_v37 }
 0xf18 PF: > { %s3476_s13 = sadd.s32 4294967295, %s2873_s18   ;;  %s2891_s28 = smov [#allocation12]  }
 0xf19   : > { %p3398_p7 = scmp.eq.s32.totalorder %s3476_s13, 1  ;;  %s2095_s29 = sshll.u32 %s2891_s28, 4  ;;  %s2096_s29 = int_to_ptr.vmem [resolvable:$true] %s2095_s29 }
 0xf1a   : > { %s2787_s24 = scalar_lea.vmem %s2096_s29, 32  ;;  %p2794_p4 = scmp.lt.s32.totalorder %s2096_s29, %s2096_s29 }
 0xf1b   : > { %p2788_p13 = scmp.ne.s32.totalorder %s2096_s29, %s2787_s24  ;;  %p2795_p2 = scmp.lt.s32.totalorder %s2787_s24, %s2787_s24 }
 0xf1d   : > { %p2789_p0 = pnand %p2788_p13, %p3398_p7  ;;  %p2796_p3 = por %p2795_p2, %p2794_p4 }
 0xf1f   : > { %p2790_p1 = pneg %p2789_p0 }
 0xf21   : > { %p2797_p8 = pnand %p2796_p3, %p2790_p1 }
 0xf23   : > { %2800 = shalt.err (!%p2797_p8)
}
 0xf24   : > { %s2892_s19 = smov 1   ;;  %s3478_s23 = sld [smem:[#allocation25_spill]] }
 0xf2a   : > { %2503 = dma.vmem_to_hbm [thread:$0]  (%p3398_p7), %s2096_s29, 32, %s3478_s23, [#allocation6], %s2886_s27, %s2886_s27, %s2892_s19  }
 0xf2b   : > { %2848 = dma.done.wait (%p3398_p7), [#allocation6], 32  }
 0xf2c   : > { %2850 = vsyncadd (%p3398_p7), [#allocation6], 4294967264 }
 0xf2d PF: > { %s30_s18 = sadd.s32 1, %s2873_s18   ;;  %s3479_s10 = sld [smem:[#allocation19_spill]] }
 0xf2e   : > { %p27_p6 = scmp.ge.s32.totalorder %s30_s18, 4   ;;  %s3480_s16 = sld [smem:[#allocation17_spill]] }
 0xf2f   : > { %s3481_s17 = sld [smem:[#allocation18_spill]]  ;;  %s3482_s29 = smov %s2857_s30 }
 0xf30   : > { %s3483_s30 = smov %s2861_s15  ;;  %29 = sbr.rel (!%p27_p6) target bundleno = 14 (0xe), region = 152 }
 0xf33   : > { %s3484_s15 = smov %s3479_s10 }
 0xf35   :  { %2111 = vsyncpa [#allocation5], 1 }
 0xf36   :  { %2113 = vsyncpa [#allocation5 + $0x1], 1 }
 0xf37   :  { %2114 = vsyncpa [#allocation8], 1 }
 0xf38   :  { %2115 = vsyncpa [#allocation11], 1 }
 0xf39   :  { %2116 = vsyncpa [#allocation6], 1 }
 0xf3a   :  { %2118 = vsyncpa [#allocation6 + $0x1], 1 }

</bundles_post_ra>
